<compile_context>
chip_gen: v7x
topology: tpu7x:2x2x1
jax: 0.10.0
libtpu: 0.0.40
codegen_flags: <defaults>
</compile_context>

<pallas_src>
import functools

import jax
import jax.numpy as jnp
import numpy as np
from jax import lax
from jax.experimental import pallas as pl
from jax.experimental.pallas import tpu as pltpu


def _sum_all(a):
    """Full reduction kept as a (1, 1) array (lane reduce, then sublane reduce)."""
    return jnp.sum(jnp.sum(a, axis=-1, keepdims=True), axis=-2, keepdims=True)


def _cluster_loss_kernel(mc_smem,                     # SMEM (TM,) int32  (scalar prefetch)
                         mcv_ref,                     # VMEM (TM, 1) int32 (same indices)
                         x_ref, h_ref, c_ref, m_ref,  # VMEM (N, D) f32
                         scores_hbm,                  # HBM  (N, N) f32 (pl.ANY)
                         out_ref,                     # VMEM (1, 1) f32
                         s_buf,                       # VMEM (TM, N) f32 scratch
                         sem,                         # DMA semaphores (TM,)
                         *, num_mc, tm):
    TM = tm
    N = x_ref.shape[0]

    # ---- 1) issue score-row gather DMAs (indices read from SMEM) -------------
    for t in range(TM):
        idx = mc_smem[t]
        pltpu.make_async_copy(scores_hbm.at[pl.ds(idx, 1), :],
                              s_buf.at[pl.ds(t, 1), :],
                              sem.at[t]).start()

    # ---- 2) base terms (independent of the DMAs, overlap with them) ----------
    X = x_ref[...]
    H = h_ref[...]
    C = c_ref[...]
    M = m_ref[...]
    dmse = (X - H + C) * M                     # == X*M - (H-C)*M
    mse = _sum_all(dmse * dmse)
    c_norm = jnp.sqrt(_sum_all(C * C))
    h_norm = jnp.sqrt(_sum_all(H * H))

    lane = lax.broadcasted_iota(jnp.int32, (TM, N), 1)
    onehot_mc = (lane == mcv_ref[...]).astype(jnp.float32)       # (TM, N)

    # ---- 3) wait for the gathered score rows ---------------------------------
    for t in range(TM):
        pltpu.make_async_copy(scores_hbm.at[pl.ds(0, 1), :],
                              s_buf.at[pl.ds(t, 1), :],
                              sem.at[t]).wait()
    S = s_buf[...]                                               # (TM, N)

    # ---- 4) top-3 smallest per row: 1 cross-lane reduce per pick -------------
    bits = pltpu.bitcast(S, jnp.int32)
    ks = bits ^ ((bits >> 31) & jnp.int32(0x7FFFFFFF))           # monotone int key
    lb = max(1, (N - 1).bit_length())                            # ceil(log2(N))
    high_mask = jnp.int32(~((1 << lb) - 1))
    keys = (ks & high_mask) | lane                               # low bits = lane index
    int_max = jnp.int32(0x7FFFFFFF)

    picks = []
    vals = []
    cur = keys
    for _ in range(3):
        mk = jnp.min(cur, axis=-1, keepdims=True)                # (TM, 1) single reduce
        pick = keys == mk                                        # exactly one lane per row
        picks.append(pick.astype(jnp.float32))
        kh = mk & high_mask                                      # drop the lane bits
        vbits = kh ^ ((kh >> 31) & jnp.int32(0x7FFFFFFF))        # invert the key map
        vals.append(pltpu.bitcast(vbits, jnp.float32))           # ~exact score value
        cur = jnp.where(pick, int_max, cur)

    # ---- 5) one MXU matmul gathers H[mc] and the 3 picked rows; exact dists --
    P = jnp.concatenate([onehot_mc] + picks, axis=0)             # (4*TM, N)
    G = jnp.dot(P, H, preferred_element_type=jnp.float32)        # (4*TM, D)
    Hm = G[0:TM]                                                 # H[mc]
    Hj = G[TM:4 * TM]                                            # picked rows, stacked
    diff = jnp.concatenate([Hm, Hm, Hm], axis=0) - Hj            # (3*TM, D)
    dall = jnp.sqrt(jnp.sum(diff * diff, axis=-1, keepdims=True))  # (3*TM, 1), exact

    # softmax(-topk) weights with max-shift (vals[0] is the smallest score)
    w0 = jnp.ones_like(vals[0])                                  # exp(v0 - v0) == 1
    w1 = jnp.exp(vals[0] - vals[1])
    w2 = jnp.exp(vals[0] - vals[2])
    num = w0 * dall[0:TM] + w1 * dall[TM:2 * TM] + w2 * dall[2 * TM:3 * TM]
    den = w0 + w1 + w2
    row_sim = num / den                                          # (TM, 1)

    valid = lax.broadcasted_iota(jnp.int32, (TM, 1), 0) < num_mc
    sim = _sum_all(jnp.where(valid, row_sim, 0.0))               # (1, 1)

    out_ref[...] = mse + sim + 0.1 * c_norm + 0.1 * h_norm


def cluster_loss(X, H, C, M, T, nM, row_scores, mc_rows):
    # T, nM accepted for signature parity but unused by the reference forward.
    del T, nM
    X = jnp.asarray(X, jnp.float32)
    H = jnp.asarray(H, jnp.float32)
    C = jnp.asarray(C, jnp.float32)
    M = jnp.asarray(M, jnp.float32)
    row_scores = jnp.asarray(row_scores, jnp.float32)

    N, D = H.shape
    num_mc = int(mc_rows.shape[0])
    TM = max(8, ((num_mc + 7) // 8) * 8)       # pad mc batch to a sublane multiple

    mc = jnp.asarray(mc_rows, jnp.int32)
    if TM > num_mc:
        mc = jnp.concatenate([mc, jnp.zeros((TM - num_mc,), jnp.int32)])
    mc_col = mc.reshape(TM, 1)

    kernel = functools.partial(_cluster_loss_kernel, num_mc=num_mc, tm=TM)
    out = pl.pallas_call(
        kernel,
        out_shape=jax.ShapeDtypeStruct((1, 1), jnp.float32),
        grid_spec=pltpu.PrefetchScalarGridSpec(
            num_scalar_prefetch=1,             # mc indices -> SMEM
            grid=(1,),
            in_specs=[
                pl.BlockSpec((TM, 1), lambda i, mc: (0, 0)),   # mc as (TM,1) vector
                pl.BlockSpec((N, D), lambda i, mc: (0, 0)),    # X
                pl.BlockSpec((N, D), lambda i, mc: (0, 0)),    # H
                pl.BlockSpec((N, D), lambda i, mc: (0, 0)),    # C
                pl.BlockSpec((N, D), lambda i, mc: (0, 0)),    # M
                pl.BlockSpec(memory_space=pl.ANY),             # row_scores stays in HBM
            ],
            out_specs=pl.BlockSpec((1, 1), lambda i, mc: (0, 0)),
            scratch_shapes=[
                pltpu.VMEM((TM, N), jnp.float32),              # gathered score rows
                pltpu.SemaphoreType.DMA((TM,)),                # one sem per row DMA
            ],
        ),
        compiler_params=pltpu.CompilerParams(
            dimension_semantics=("arbitrary",)),
    )(mc, mc_col, X, H, C, M, row_scores)
    return out[0, 0]


def _reference_loss(X, H, C, M, row_scores, mc_rows):
    """Pure numpy mirror of the PyTorch forward pass."""
    Xn, Hn, Cn, Mn, Sn = (np.asarray(a, np.float32) for a in (X, H, C, M, row_scores))
    sim = 0.0
    for i in np.asarray(mc_rows):
        row = Sn[i]
        idx = np.argsort(row)[:3]              # 3 smallest, like topk(largest=False)
        topk = row[idx]
        w = np.exp(-topk - np.max(-topk))
        w = w / w.sum()
        for k in range(3):
            sim += w[k] * np.linalg.norm(Hn[i] - Hn[idx[k]])
    mse = np.sum((Xn * Mn - (Hn - Cn) * Mn) ** 2)
    return float(mse + sim + 0.1 * np.linalg.norm(Cn) + 0.1 * np.linalg.norm(Hn))


if __name__ == "__main__":
    N, D = 16, 32
    key = jax.random.PRNGKey(0)
    kx, kh, kc, km, ks = jax.random.split(key, 5)

    X = jax.random.normal(kx, (N, D), jnp.float32)
    H = jax.random.normal(kh, (N, D), jnp.float32)
    C = jax.random.normal(kc, (N, D), jnp.float32)
    M = (jax.random.uniform(km, (N, D)) > 0.5).astype(jnp.float32)
    row_scores = jax.random.uniform(ks, (N, N), dtype=jnp.float32)
    mc_rows = jnp.array([1, 5, 9, 12], dtype=jnp.int32)
    T = None   # unused by forward
    nM = None  # unused by forward

    loss = cluster_loss(X, H, C, M, T, nM, row_scores, mc_rows)
    loss = jax.block_until_ready(loss)

    ref = _reference_loss(X, H, C, M, row_scores, mc_rows)
    assert np.allclose(float(loss), ref, rtol=2e-3, atol=2e-3), (float(loss), ref)
    print("KERNEL_OK")
</pallas_src>

<mosaic_0001>
module attributes {stable_mosaic.version = 11 : i64} {
  func.func @_cluster_loss_kernel(%arg0: i32, %arg1: memref<8xi32, #tpu.memory_space<smem>>, %arg2: memref<8x1xi32, #tpu.memory_space<vmem>>, %arg3: memref<16x32xf32, #tpu.memory_space<vmem>>, %arg4: memref<16x32xf32, #tpu.memory_space<vmem>>, %arg5: memref<16x32xf32, #tpu.memory_space<vmem>>, %arg6: memref<16x32xf32, #tpu.memory_space<vmem>>, %arg7: memref<16x16xf32, #tpu.memory_space<any>>, %arg8: memref<1x1xf32, #tpu.memory_space<vmem>>, %arg9: memref<8x16xf32, #tpu.memory_space<vmem>>, %arg10: memref<8x!tpu.dma_semaphore, #tpu.memory_space<semaphore_mem>>) attributes {dimension_semantics = [#tpu.dimension_semantics<arbitrary>], iteration_bounds = array<i64: 1>, scalar_prefetch = 1 : i64, scratch_operands = 2 : i64, tpu.core_type = #tpu.core_type<tc>, window_params = [{pipeline_mode = #tpu.pipeline_mode<synchronous>, transform_indices = @transform_0, window_bounds = array<i64: 8, 1>}, {pipeline_mode = #tpu.pipeline_mode<synchronous>, transform_indices = @transform_1, window_bounds = array<i64: 16, 32>}, {pipeline_mode = #tpu.pipeline_mode<synchronous>, transform_indices = @transform_2, window_bounds = array<i64: 16, 32>}, {pipeline_mode = #tpu.pipeline_mode<synchronous>, transform_indices = @transform_3, window_bounds = array<i64: 16, 32>}, {pipeline_mode = #tpu.pipeline_mode<synchronous>, transform_indices = @transform_4, window_bounds = array<i64: 16, 32>}, {}, {pipeline_mode = #tpu.pipeline_mode<synchronous>, transform_indices = @transform_6, window_bounds = array<i64: 1, 1>}]} {
    %c0 = arith.constant 0 : index
    %0 = memref.load %arg1[%c0] : memref<8xi32, #tpu.memory_space<smem>>
    %c0_i32 = arith.constant 0 : i32
    %c0_i32_0 = arith.constant 0 : i32
    %1 = tpu.memref_slice %arg7[%0, %c0_i32_0] : memref<16x16xf32, #tpu.memory_space<any>> -> memref<1x16xf32, #tpu.memory_space<any>>
    %c0_i32_1 = arith.constant 0 : i32
    %c0_i32_2 = arith.constant 0 : i32
    %2 = tpu.memref_slice %arg9[%c0_i32_1, %c0_i32_2] : memref<8x16xf32, #tpu.memory_space<vmem>> -> memref<1x16xf32, #tpu.memory_space<vmem>>
    %3 = tpu.memref_slice %arg10[%c0_i32] : memref<8x!tpu.dma_semaphore, #tpu.memory_space<semaphore_mem>> -> memref<1x!tpu.dma_semaphore, #tpu.memory_space<semaphore_mem>>
    %4 = tpu.memref_squeeze %3 : memref<1x!tpu.dma_semaphore, #tpu.memory_space<semaphore_mem>> -> memref<!tpu.dma_semaphore, #tpu.memory_space<semaphore_mem>>
    tpu.enqueue_dma source(%1 : memref<1x16xf32, #tpu.memory_space<any>>) target(%2 : memref<1x16xf32, #tpu.memory_space<vmem>>) target_semaphore(%4 : memref<!tpu.dma_semaphore, #tpu.memory_space<semaphore_mem>>)
    %c1 = arith.constant 1 : index
    %5 = memref.load %arg1[%c1] : memref<8xi32, #tpu.memory_space<smem>>
    %c1_i32 = arith.constant 1 : i32
    %c0_i32_3 = arith.constant 0 : i32
    %6 = tpu.memref_slice %arg7[%5, %c0_i32_3] : memref<16x16xf32, #tpu.memory_space<any>> -> memref<1x16xf32, #tpu.memory_space<any>>
    %c1_i32_4 = arith.constant 1 : i32
    %c0_i32_5 = arith.constant 0 : i32
    %7 = tpu.memref_slice %arg9[%c1_i32_4, %c0_i32_5] : memref<8x16xf32, #tpu.memory_space<vmem>> -> memref<1x16xf32, #tpu.memory_space<vmem>>
    %8 = tpu.memref_slice %arg10[%c1_i32] : memref<8x!tpu.dma_semaphore, #tpu.memory_space<semaphore_mem>> -> memref<1x!tpu.dma_semaphore, #tpu.memory_space<semaphore_mem>>
    %9 = tpu.memref_squeeze %8 : memref<1x!tpu.dma_semaphore, #tpu.memory_space<semaphore_mem>> -> memref<!tpu.dma_semaphore, #tpu.memory_space<semaphore_mem>>
    tpu.enqueue_dma source(%6 : memref<1x16xf32, #tpu.memory_space<any>>) target(%7 : memref<1x16xf32, #tpu.memory_space<vmem>>) target_semaphore(%9 : memref<!tpu.dma_semaphore, #tpu.memory_space<semaphore_mem>>)
    %c2 = arith.constant 2 : index
    %10 = memref.load %arg1[%c2] : memref<8xi32, #tpu.memory_space<smem>>
    %c2_i32 = arith.constant 2 : i32
    %c0_i32_6 = arith.constant 0 : i32
    %11 = tpu.memref_slice %arg7[%10, %c0_i32_6] : memref<16x16xf32, #tpu.memory_space<any>> -> memref<1x16xf32, #tpu.memory_space<any>>
    %c2_i32_7 = arith.constant 2 : i32
    %c0_i32_8 = arith.constant 0 : i32
    %12 = tpu.memref_slice %arg9[%c2_i32_7, %c0_i32_8] : memref<8x16xf32, #tpu.memory_space<vmem>> -> memref<1x16xf32, #tpu.memory_space<vmem>>
    %13 = tpu.memref_slice %arg10[%c2_i32] : memref<8x!tpu.dma_semaphore, #tpu.memory_space<semaphore_mem>> -> memref<1x!tpu.dma_semaphore, #tpu.memory_space<semaphore_mem>>
    %14 = tpu.memref_squeeze %13 : memref<1x!tpu.dma_semaphore, #tpu.memory_space<semaphore_mem>> -> memref<!tpu.dma_semaphore, #tpu.memory_space<semaphore_mem>>
    tpu.enqueue_dma source(%11 : memref<1x16xf32, #tpu.memory_space<any>>) target(%12 : memref<1x16xf32, #tpu.memory_space<vmem>>) target_semaphore(%14 : memref<!tpu.dma_semaphore, #tpu.memory_space<semaphore_mem>>)
    %c3 = arith.constant 3 : index
    %15 = memref.load %arg1[%c3] : memref<8xi32, #tpu.memory_space<smem>>
    %c3_i32 = arith.constant 3 : i32
    %c0_i32_9 = arith.constant 0 : i32
    %16 = tpu.memref_slice %arg7[%15, %c0_i32_9] : memref<16x16xf32, #tpu.memory_space<any>> -> memref<1x16xf32, #tpu.memory_space<any>>
    %c3_i32_10 = arith.constant 3 : i32
    %c0_i32_11 = arith.constant 0 : i32
    %17 = tpu.memref_slice %arg9[%c3_i32_10, %c0_i32_11] : memref<8x16xf32, #tpu.memory_space<vmem>> -> memref<1x16xf32, #tpu.memory_space<vmem>>
    %18 = tpu.memref_slice %arg10[%c3_i32] : memref<8x!tpu.dma_semaphore, #tpu.memory_space<semaphore_mem>> -> memref<1x!tpu.dma_semaphore, #tpu.memory_space<semaphore_mem>>
    %19 = tpu.memref_squeeze %18 : memref<1x!tpu.dma_semaphore, #tpu.memory_space<semaphore_mem>> -> memref<!tpu.dma_semaphore, #tpu.memory_space<semaphore_mem>>
    tpu.enqueue_dma source(%16 : memref<1x16xf32, #tpu.memory_space<any>>) target(%17 : memref<1x16xf32, #tpu.memory_space<vmem>>) target_semaphore(%19 : memref<!tpu.dma_semaphore, #tpu.memory_space<semaphore_mem>>)
    %c4 = arith.constant 4 : index
    %20 = memref.load %arg1[%c4] : memref<8xi32, #tpu.memory_space<smem>>
    %c4_i32 = arith.constant 4 : i32
    %c0_i32_12 = arith.constant 0 : i32
    %21 = tpu.memref_slice %arg7[%20, %c0_i32_12] : memref<16x16xf32, #tpu.memory_space<any>> -> memref<1x16xf32, #tpu.memory_space<any>>
    %c4_i32_13 = arith.constant 4 : i32
    %c0_i32_14 = arith.constant 0 : i32
    %22 = tpu.memref_slice %arg9[%c4_i32_13, %c0_i32_14] : memref<8x16xf32, #tpu.memory_space<vmem>> -> memref<1x16xf32, #tpu.memory_space<vmem>>
    %23 = tpu.memref_slice %arg10[%c4_i32] : memref<8x!tpu.dma_semaphore, #tpu.memory_space<semaphore_mem>> -> memref<1x!tpu.dma_semaphore, #tpu.memory_space<semaphore_mem>>
    %24 = tpu.memref_squeeze %23 : memref<1x!tpu.dma_semaphore, #tpu.memory_space<semaphore_mem>> -> memref<!tpu.dma_semaphore, #tpu.memory_space<semaphore_mem>>
    tpu.enqueue_dma source(%21 : memref<1x16xf32, #tpu.memory_space<any>>) target(%22 : memref<1x16xf32, #tpu.memory_space<vmem>>) target_semaphore(%24 : memref<!tpu.dma_semaphore, #tpu.memory_space<semaphore_mem>>)
    %c5 = arith.constant 5 : index
    %25 = memref.load %arg1[%c5] : memref<8xi32, #tpu.memory_space<smem>>
    %c5_i32 = arith.constant 5 : i32
    %c0_i32_15 = arith.constant 0 : i32
    %26 = tpu.memref_slice %arg7[%25, %c0_i32_15] : memref<16x16xf32, #tpu.memory_space<any>> -> memref<1x16xf32, #tpu.memory_space<any>>
    %c5_i32_16 = arith.constant 5 : i32
    %c0_i32_17 = arith.constant 0 : i32
    %27 = tpu.memref_slice %arg9[%c5_i32_16, %c0_i32_17] : memref<8x16xf32, #tpu.memory_space<vmem>> -> memref<1x16xf32, #tpu.memory_space<vmem>>
    %28 = tpu.memref_slice %arg10[%c5_i32] : memref<8x!tpu.dma_semaphore, #tpu.memory_space<semaphore_mem>> -> memref<1x!tpu.dma_semaphore, #tpu.memory_space<semaphore_mem>>
    %29 = tpu.memref_squeeze %28 : memref<1x!tpu.dma_semaphore, #tpu.memory_space<semaphore_mem>> -> memref<!tpu.dma_semaphore, #tpu.memory_space<semaphore_mem>>
    tpu.enqueue_dma source(%26 : memref<1x16xf32, #tpu.memory_space<any>>) target(%27 : memref<1x16xf32, #tpu.memory_space<vmem>>) target_semaphore(%29 : memref<!tpu.dma_semaphore, #tpu.memory_space<semaphore_mem>>)
    %c6 = arith.constant 6 : index
    %30 = memref.load %arg1[%c6] : memref<8xi32, #tpu.memory_space<smem>>
    %c6_i32 = arith.constant 6 : i32
    %c0_i32_18 = arith.constant 0 : i32
    %31 = tpu.memref_slice %arg7[%30, %c0_i32_18] : memref<16x16xf32, #tpu.memory_space<any>> -> memref<1x16xf32, #tpu.memory_space<any>>
    %c6_i32_19 = arith.constant 6 : i32
    %c0_i32_20 = arith.constant 0 : i32
    %32 = tpu.memref_slice %arg9[%c6_i32_19, %c0_i32_20] : memref<8x16xf32, #tpu.memory_space<vmem>> -> memref<1x16xf32, #tpu.memory_space<vmem>>
    %33 = tpu.memref_slice %arg10[%c6_i32] : memref<8x!tpu.dma_semaphore, #tpu.memory_space<semaphore_mem>> -> memref<1x!tpu.dma_semaphore, #tpu.memory_space<semaphore_mem>>
    %34 = tpu.memref_squeeze %33 : memref<1x!tpu.dma_semaphore, #tpu.memory_space<semaphore_mem>> -> memref<!tpu.dma_semaphore, #tpu.memory_space<semaphore_mem>>
    tpu.enqueue_dma source(%31 : memref<1x16xf32, #tpu.memory_space<any>>) target(%32 : memref<1x16xf32, #tpu.memory_space<vmem>>) target_semaphore(%34 : memref<!tpu.dma_semaphore, #tpu.memory_space<semaphore_mem>>)
    %c7 = arith.constant 7 : index
    %35 = memref.load %arg1[%c7] : memref<8xi32, #tpu.memory_space<smem>>
    %c7_i32 = arith.constant 7 : i32
    %c0_i32_21 = arith.constant 0 : i32
    %36 = tpu.memref_slice %arg7[%35, %c0_i32_21] : memref<16x16xf32, #tpu.memory_space<any>> -> memref<1x16xf32, #tpu.memory_space<any>>
    %c7_i32_22 = arith.constant 7 : i32
    %c0_i32_23 = arith.constant 0 : i32
    %37 = tpu.memref_slice %arg9[%c7_i32_22, %c0_i32_23] : memref<8x16xf32, #tpu.memory_space<vmem>> -> memref<1x16xf32, #tpu.memory_space<vmem>>
    %38 = tpu.memref_slice %arg10[%c7_i32] : memref<8x!tpu.dma_semaphore, #tpu.memory_space<semaphore_mem>> -> memref<1x!tpu.dma_semaphore, #tpu.memory_space<semaphore_mem>>
    %39 = tpu.memref_squeeze %38 : memref<1x!tpu.dma_semaphore, #tpu.memory_space<semaphore_mem>> -> memref<!tpu.dma_semaphore, #tpu.memory_space<semaphore_mem>>
    tpu.enqueue_dma source(%36 : memref<1x16xf32, #tpu.memory_space<any>>) target(%37 : memref<1x16xf32, #tpu.memory_space<vmem>>) target_semaphore(%39 : memref<!tpu.dma_semaphore, #tpu.memory_space<semaphore_mem>>)
    %c0_24 = arith.constant 0 : index
    %c0_25 = arith.constant 0 : index
    %40 = vector.load %arg3[%c0_24, %c0_25] : memref<16x32xf32, #tpu.memory_space<vmem>>, vector<16x32xf32>
    %c0_26 = arith.constant 0 : index
    %c0_27 = arith.constant 0 : index
    %41 = vector.load %arg4[%c0_26, %c0_27] : memref<16x32xf32, #tpu.memory_space<vmem>>, vector<16x32xf32>
    %c0_28 = arith.constant 0 : index
    %c0_29 = arith.constant 0 : index
    %42 = vector.load %arg5[%c0_28, %c0_29] : memref<16x32xf32, #tpu.memory_space<vmem>>, vector<16x32xf32>
    %c0_30 = arith.constant 0 : index
    %c0_31 = arith.constant 0 : index
    %43 = vector.load %arg6[%c0_30, %c0_31] : memref<16x32xf32, #tpu.memory_space<vmem>>, vector<16x32xf32>
    %44 = arith.subf %40, %41 : vector<16x32xf32>
    %45 = arith.addf %44, %42 : vector<16x32xf32>
    %46 = arith.mulf %45, %43 : vector<16x32xf32>
    %47 = arith.mulf %46, %46 : vector<16x32xf32>
    %cst = arith.constant dense<0.000000e+00> : vector<16xf32>
    %48 = vector.multi_reduction <add>, %47, %cst [1] : vector<16x32xf32> to vector<16xf32>
    %49 = vector.shape_cast %48 : vector<16xf32> to vector<16x1xf32>
    %cst_32 = arith.constant dense<0.000000e+00> : vector<1xf32>
    %50 = vector.multi_reduction <add>, %49, %cst_32 [0] : vector<16x1xf32> to vector<1xf32>
    %51 = vector.shape_cast %50 : vector<1xf32> to vector<1x1xf32>
    %52 = arith.mulf %42, %42 : vector<16x32xf32>
    %cst_33 = arith.constant dense<0.000000e+00> : vector<16xf32>
    %53 = vector.multi_reduction <add>, %52, %cst_33 [1] : vector<16x32xf32> to vector<16xf32>
    %54 = vector.shape_cast %53 : vector<16xf32> to vector<16x1xf32>
    %cst_34 = arith.constant dense<0.000000e+00> : vector<1xf32>
    %55 = vector.multi_reduction <add>, %54, %cst_34 [0] : vector<16x1xf32> to vector<1xf32>
    %56 = vector.shape_cast %55 : vector<1xf32> to vector<1x1xf32>
    %57 = math.sqrt %56 : vector<1x1xf32>
    %58 = arith.mulf %41, %41 : vector<16x32xf32>
    %cst_35 = arith.constant dense<0.000000e+00> : vector<16xf32>
    %59 = vector.multi_reduction <add>, %58, %cst_35 [1] : vector<16x32xf32> to vector<16xf32>
    %60 = vector.shape_cast %59 : vector<16xf32> to vector<16x1xf32>
    %cst_36 = arith.constant dense<0.000000e+00> : vector<1xf32>
    %61 = vector.multi_reduction <add>, %60, %cst_36 [0] : vector<16x1xf32> to vector<1xf32>
    %62 = vector.shape_cast %61 : vector<1xf32> to vector<1x1xf32>
    %63 = math.sqrt %62 : vector<1x1xf32>
    %64 = tpu.iota {dimensions = array<i32: 1>} : vector<8x16xi32>
    %c0_37 = arith.constant 0 : index
    %c0_38 = arith.constant 0 : index
    %65 = vector.load %arg2[%c0_37, %c0_38] : memref<8x1xi32, #tpu.memory_space<vmem>>, vector<8x1xi32>
    %66 = vector.broadcast %65 : vector<8x1xi32> to vector<8x16xi32>
    %67 = arith.cmpi eq, %64, %66 : vector<8x16xi32>
    %68 = arith.extui %67 : vector<8x16xi1> to vector<8x16xi32>
    %69 = arith.sitofp %68 : vector<8x16xi32> to vector<8x16xf32>
    %c0_i32_39 = arith.constant 0 : i32
    %c0_i32_40 = arith.constant 0 : i32
    %c0_i32_41 = arith.constant 0 : i32
    %70 = tpu.memref_slice %arg7[%c0_i32_40, %c0_i32_41] : memref<16x16xf32, #tpu.memory_space<any>> -> memref<1x16xf32, #tpu.memory_space<any>>
    %c0_i32_42 = arith.constant 0 : i32
    %c0_i32_43 = arith.constant 0 : i32
    %71 = tpu.memref_slice %arg9[%c0_i32_42, %c0_i32_43] : memref<8x16xf32, #tpu.memory_space<vmem>> -> memref<1x16xf32, #tpu.memory_space<vmem>>
    %72 = tpu.memref_slice %arg10[%c0_i32_39] : memref<8x!tpu.dma_semaphore, #tpu.memory_space<semaphore_mem>> -> memref<1x!tpu.dma_semaphore, #tpu.memory_space<semaphore_mem>>
    %73 = tpu.memref_squeeze %72 : memref<1x!tpu.dma_semaphore, #tpu.memory_space<semaphore_mem>> -> memref<!tpu.dma_semaphore, #tpu.memory_space<semaphore_mem>>
    tpu.wait_dma2 semaphore(%73 : memref<!tpu.dma_semaphore, #tpu.memory_space<semaphore_mem>>) src(%70 : memref<1x16xf32, #tpu.memory_space<any>>) dst(%71 : memref<1x16xf32, #tpu.memory_space<vmem>>)
    %c1_i32_44 = arith.constant 1 : i32
    %c0_i32_45 = arith.constant 0 : i32
    %c0_i32_46 = arith.constant 0 : i32
    %74 = tpu.memref_slice %arg7[%c0_i32_45, %c0_i32_46] : memref<16x16xf32, #tpu.memory_space<any>> -> memref<1x16xf32, #tpu.memory_space<any>>
    %c1_i32_47 = arith.constant 1 : i32
    %c0_i32_48 = arith.constant 0 : i32
    %75 = tpu.memref_slice %arg9[%c1_i32_47, %c0_i32_48] : memref<8x16xf32, #tpu.memory_space<vmem>> -> memref<1x16xf32, #tpu.memory_space<vmem>>
    %76 = tpu.memref_slice %arg10[%c1_i32_44] : memref<8x!tpu.dma_semaphore, #tpu.memory_space<semaphore_mem>> -> memref<1x!tpu.dma_semaphore, #tpu.memory_space<semaphore_mem>>
    %77 = tpu.memref_squeeze %76 : memref<1x!tpu.dma_semaphore, #tpu.memory_space<semaphore_mem>> -> memref<!tpu.dma_semaphore, #tpu.memory_space<semaphore_mem>>
    tpu.wait_dma2 semaphore(%77 : memref<!tpu.dma_semaphore, #tpu.memory_space<semaphore_mem>>) src(%74 : memref<1x16xf32, #tpu.memory_space<any>>) dst(%75 : memref<1x16xf32, #tpu.memory_space<vmem>>)
    %c2_i32_49 = arith.constant 2 : i32
    %c0_i32_50 = arith.constant 0 : i32
    %c0_i32_51 = arith.constant 0 : i32
    %78 = tpu.memref_slice %arg7[%c0_i32_50, %c0_i32_51] : memref<16x16xf32, #tpu.memory_space<any>> -> memref<1x16xf32, #tpu.memory_space<any>>
    %c2_i32_52 = arith.constant 2 : i32
    %c0_i32_53 = arith.constant 0 : i32
    %79 = tpu.memref_slice %arg9[%c2_i32_52, %c0_i32_53] : memref<8x16xf32, #tpu.memory_space<vmem>> -> memref<1x16xf32, #tpu.memory_space<vmem>>
    %80 = tpu.memref_slice %arg10[%c2_i32_49] : memref<8x!tpu.dma_semaphore, #tpu.memory_space<semaphore_mem>> -> memref<1x!tpu.dma_semaphore, #tpu.memory_space<semaphore_mem>>
    %81 = tpu.memref_squeeze %80 : memref<1x!tpu.dma_semaphore, #tpu.memory_space<semaphore_mem>> -> memref<!tpu.dma_semaphore, #tpu.memory_space<semaphore_mem>>
    tpu.wait_dma2 semaphore(%81 : memref<!tpu.dma_semaphore, #tpu.memory_space<semaphore_mem>>) src(%78 : memref<1x16xf32, #tpu.memory_space<any>>) dst(%79 : memref<1x16xf32, #tpu.memory_space<vmem>>)
    %c3_i32_54 = arith.constant 3 : i32
    %c0_i32_55 = arith.constant 0 : i32
    %c0_i32_56 = arith.constant 0 : i32
    %82 = tpu.memref_slice %arg7[%c0_i32_55, %c0_i32_56] : memref<16x16xf32, #tpu.memory_space<any>> -> memref<1x16xf32, #tpu.memory_space<any>>
    %c3_i32_57 = arith.constant 3 : i32
    %c0_i32_58 = arith.constant 0 : i32
    %83 = tpu.memref_slice %arg9[%c3_i32_57, %c0_i32_58] : memref<8x16xf32, #tpu.memory_space<vmem>> -> memref<1x16xf32, #tpu.memory_space<vmem>>
    %84 = tpu.memref_slice %arg10[%c3_i32_54] : memref<8x!tpu.dma_semaphore, #tpu.memory_space<semaphore_mem>> -> memref<1x!tpu.dma_semaphore, #tpu.memory_space<semaphore_mem>>
    %85 = tpu.memref_squeeze %84 : memref<1x!tpu.dma_semaphore, #tpu.memory_space<semaphore_mem>> -> memref<!tpu.dma_semaphore, #tpu.memory_space<semaphore_mem>>
    tpu.wait_dma2 semaphore(%85 : memref<!tpu.dma_semaphore, #tpu.memory_space<semaphore_mem>>) src(%82 : memref<1x16xf32, #tpu.memory_space<any>>) dst(%83 : memref<1x16xf32, #tpu.memory_space<vmem>>)
    %c4_i32_59 = arith.constant 4 : i32
    %c0_i32_60 = arith.constant 0 : i32
    %c0_i32_61 = arith.constant 0 : i32
    %86 = tpu.memref_slice %arg7[%c0_i32_60, %c0_i32_61] : memref<16x16xf32, #tpu.memory_space<any>> -> memref<1x16xf32, #tpu.memory_space<any>>
    %c4_i32_62 = arith.constant 4 : i32
    %c0_i32_63 = arith.constant 0 : i32
    %87 = tpu.memref_slice %arg9[%c4_i32_62, %c0_i32_63] : memref<8x16xf32, #tpu.memory_space<vmem>> -> memref<1x16xf32, #tpu.memory_space<vmem>>
    %88 = tpu.memref_slice %arg10[%c4_i32_59] : memref<8x!tpu.dma_semaphore, #tpu.memory_space<semaphore_mem>> -> memref<1x!tpu.dma_semaphore, #tpu.memory_space<semaphore_mem>>
    %89 = tpu.memref_squeeze %88 : memref<1x!tpu.dma_semaphore, #tpu.memory_space<semaphore_mem>> -> memref<!tpu.dma_semaphore, #tpu.memory_space<semaphore_mem>>
    tpu.wait_dma2 semaphore(%89 : memref<!tpu.dma_semaphore, #tpu.memory_space<semaphore_mem>>) src(%86 : memref<1x16xf32, #tpu.memory_space<any>>) dst(%87 : memref<1x16xf32, #tpu.memory_space<vmem>>)
    %c5_i32_64 = arith.constant 5 : i32
    %c0_i32_65 = arith.constant 0 : i32
    %c0_i32_66 = arith.constant 0 : i32
    %90 = tpu.memref_slice %arg7[%c0_i32_65, %c0_i32_66] : memref<16x16xf32, #tpu.memory_space<any>> -> memref<1x16xf32, #tpu.memory_space<any>>
    %c5_i32_67 = arith.constant 5 : i32
    %c0_i32_68 = arith.constant 0 : i32
    %91 = tpu.memref_slice %arg9[%c5_i32_67, %c0_i32_68] : memref<8x16xf32, #tpu.memory_space<vmem>> -> memref<1x16xf32, #tpu.memory_space<vmem>>
    %92 = tpu.memref_slice %arg10[%c5_i32_64] : memref<8x!tpu.dma_semaphore, #tpu.memory_space<semaphore_mem>> -> memref<1x!tpu.dma_semaphore, #tpu.memory_space<semaphore_mem>>
    %93 = tpu.memref_squeeze %92 : memref<1x!tpu.dma_semaphore, #tpu.memory_space<semaphore_mem>> -> memref<!tpu.dma_semaphore, #tpu.memory_space<semaphore_mem>>
    tpu.wait_dma2 semaphore(%93 : memref<!tpu.dma_semaphore, #tpu.memory_space<semaphore_mem>>) src(%90 : memref<1x16xf32, #tpu.memory_space<any>>) dst(%91 : memref<1x16xf32, #tpu.memory_space<vmem>>)
    %c6_i32_69 = arith.constant 6 : i32
    %c0_i32_70 = arith.constant 0 : i32
    %c0_i32_71 = arith.constant 0 : i32
    %94 = tpu.memref_slice %arg7[%c0_i32_70, %c0_i32_71] : memref<16x16xf32, #tpu.memory_space<any>> -> memref<1x16xf32, #tpu.memory_space<any>>
    %c6_i32_72 = arith.constant 6 : i32
    %c0_i32_73 = arith.constant 0 : i32
    %95 = tpu.memref_slice %arg9[%c6_i32_72, %c0_i32_73] : memref<8x16xf32, #tpu.memory_space<vmem>> -> memref<1x16xf32, #tpu.memory_space<vmem>>
    %96 = tpu.memref_slice %arg10[%c6_i32_69] : memref<8x!tpu.dma_semaphore, #tpu.memory_space<semaphore_mem>> -> memref<1x!tpu.dma_semaphore, #tpu.memory_space<semaphore_mem>>
    %97 = tpu.memref_squeeze %96 : memref<1x!tpu.dma_semaphore, #tpu.memory_space<semaphore_mem>> -> memref<!tpu.dma_semaphore, #tpu.memory_space<semaphore_mem>>
    tpu.wait_dma2 semaphore(%97 : memref<!tpu.dma_semaphore, #tpu.memory_space<semaphore_mem>>) src(%94 : memref<1x16xf32, #tpu.memory_space<any>>) dst(%95 : memref<1x16xf32, #tpu.memory_space<vmem>>)
    %c7_i32_74 = arith.constant 7 : i32
    %c0_i32_75 = arith.constant 0 : i32
    %c0_i32_76 = arith.constant 0 : i32
    %98 = tpu.memref_slice %arg7[%c0_i32_75, %c0_i32_76] : memref<16x16xf32, #tpu.memory_space<any>> -> memref<1x16xf32, #tpu.memory_space<any>>
    %c7_i32_77 = arith.constant 7 : i32
    %c0_i32_78 = arith.constant 0 : i32
    %99 = tpu.memref_slice %arg9[%c7_i32_77, %c0_i32_78] : memref<8x16xf32, #tpu.memory_space<vmem>> -> memref<1x16xf32, #tpu.memory_space<vmem>>
    %100 = tpu.memref_slice %arg10[%c7_i32_74] : memref<8x!tpu.dma_semaphore, #tpu.memory_space<semaphore_mem>> -> memref<1x!tpu.dma_semaphore, #tpu.memory_space<semaphore_mem>>
    %101 = tpu.memref_squeeze %100 : memref<1x!tpu.dma_semaphore, #tpu.memory_space<semaphore_mem>> -> memref<!tpu.dma_semaphore, #tpu.memory_space<semaphore_mem>>
    tpu.wait_dma2 semaphore(%101 : memref<!tpu.dma_semaphore, #tpu.memory_space<semaphore_mem>>) src(%98 : memref<1x16xf32, #tpu.memory_space<any>>) dst(%99 : memref<1x16xf32, #tpu.memory_space<vmem>>)
    %c0_79 = arith.constant 0 : index
    %c0_80 = arith.constant 0 : index
    %102 = vector.load %arg9[%c0_79, %c0_80] : memref<8x16xf32, #tpu.memory_space<vmem>>, vector<8x16xf32>
    %103 = tpu.bitcast %102 : vector<8x16xf32> -> vector<8x16xi32>
    %c31_i32 = arith.constant 31 : i32
    %104 = vector.broadcast %c31_i32 : i32 to vector<8x16xi32>
    %105 = arith.shrsi %103, %104 : vector<8x16xi32>
    %c2147483647_i32 = arith.constant 2147483647 : i32
    %106 = vector.broadcast %c2147483647_i32 : i32 to vector<8x16xi32>
    %107 = arith.andi %105, %106 : vector<8x16xi32>
    %108 = arith.xori %103, %107 : vector<8x16xi32>
    %c-16_i32 = arith.constant -16 : i32
    %109 = vector.broadcast %c-16_i32 : i32 to vector<8x16xi32>
    %110 = arith.andi %108, %109 : vector<8x16xi32>
    %111 = arith.ori %110, %64 : vector<8x16xi32>
    %cst_81 = arith.constant dense<2147483647> : vector<8xi32>
    %112 = vector.multi_reduction <minsi>, %111, %cst_81 [1] : vector<8x16xi32> to vector<8xi32>
    %113 = vector.shape_cast %112 : vector<8xi32> to vector<8x1xi32>
    %114 = vector.broadcast %113 : vector<8x1xi32> to vector<8x16xi32>
    %115 = arith.cmpi eq, %111, %114 : vector<8x16xi32>
    %116 = arith.extui %115 : vector<8x16xi1> to vector<8x16xi32>
    %117 = arith.sitofp %116 : vector<8x16xi32> to vector<8x16xf32>
    %c-16_i32_82 = arith.constant -16 : i32
    %118 = vector.broadcast %c-16_i32_82 : i32 to vector<8x1xi32>
    %119 = arith.andi %113, %118 : vector<8x1xi32>
    %c31_i32_83 = arith.constant 31 : i32
    %120 = vector.broadcast %c31_i32_83 : i32 to vector<8x1xi32>
    %121 = arith.shrsi %119, %120 : vector<8x1xi32>
    %c2147483647_i32_84 = arith.constant 2147483647 : i32
    %122 = vector.broadcast %c2147483647_i32_84 : i32 to vector<8x1xi32>
    %123 = arith.andi %121, %122 : vector<8x1xi32>
    %124 = arith.xori %119, %123 : vector<8x1xi32>
    %125 = tpu.bitcast %124 : vector<8x1xi32> -> vector<8x1xf32>
    %c2147483647_i32_85 = arith.constant 2147483647 : i32
    %126 = vector.broadcast %c2147483647_i32_85 : i32 to vector<8x16xi32>
    %127 = arith.select %115, %126, %111 : vector<8x16xi1>, vector<8x16xi32>
    %cst_86 = arith.constant dense<2147483647> : vector<8xi32>
    %128 = vector.multi_reduction <minsi>, %127, %cst_86 [1] : vector<8x16xi32> to vector<8xi32>
    %129 = vector.shape_cast %128 : vector<8xi32> to vector<8x1xi32>
    %130 = vector.broadcast %129 : vector<8x1xi32> to vector<8x16xi32>
    %131 = arith.cmpi eq, %111, %130 : vector<8x16xi32>
    %132 = arith.extui %131 : vector<8x16xi1> to vector<8x16xi32>
    %133 = arith.sitofp %132 : vector<8x16xi32> to vector<8x16xf32>
    %c-16_i32_87 = arith.constant -16 : i32
    %134 = vector.broadcast %c-16_i32_87 : i32 to vector<8x1xi32>
    %135 = arith.andi %129, %134 : vector<8x1xi32>
    %c31_i32_88 = arith.constant 31 : i32
    %136 = vector.broadcast %c31_i32_88 : i32 to vector<8x1xi32>
    %137 = arith.shrsi %135, %136 : vector<8x1xi32>
    %c2147483647_i32_89 = arith.constant 2147483647 : i32
    %138 = vector.broadcast %c2147483647_i32_89 : i32 to vector<8x1xi32>
    %139 = arith.andi %137, %138 : vector<8x1xi32>
    %140 = arith.xori %135, %139 : vector<8x1xi32>
    %141 = tpu.bitcast %140 : vector<8x1xi32> -> vector<8x1xf32>
    %c2147483647_i32_90 = arith.constant 2147483647 : i32
    %142 = vector.broadcast %c2147483647_i32_90 : i32 to vector<8x16xi32>
    %143 = arith.select %131, %142, %127 : vector<8x16xi1>, vector<8x16xi32>
    %cst_91 = arith.constant dense<2147483647> : vector<8xi32>
    %144 = vector.multi_reduction <minsi>, %143, %cst_91 [1] : vector<8x16xi32> to vector<8xi32>
    %145 = vector.shape_cast %144 : vector<8xi32> to vector<8x1xi32>
    %146 = vector.broadcast %145 : vector<8x1xi32> to vector<8x16xi32>
    %147 = arith.cmpi eq, %111, %146 : vector<8x16xi32>
    %148 = arith.extui %147 : vector<8x16xi1> to vector<8x16xi32>
    %149 = arith.sitofp %148 : vector<8x16xi32> to vector<8x16xf32>
    %c-16_i32_92 = arith.constant -16 : i32
    %150 = vector.broadcast %c-16_i32_92 : i32 to vector<8x1xi32>
    %151 = arith.andi %145, %150 : vector<8x1xi32>
    %c31_i32_93 = arith.constant 31 : i32
    %152 = vector.broadcast %c31_i32_93 : i32 to vector<8x1xi32>
    %153 = arith.shrsi %151, %152 : vector<8x1xi32>
    %c2147483647_i32_94 = arith.constant 2147483647 : i32
    %154 = vector.broadcast %c2147483647_i32_94 : i32 to vector<8x1xi32>
    %155 = arith.andi %153, %154 : vector<8x1xi32>
    %156 = arith.xori %151, %155 : vector<8x1xi32>
    %157 = tpu.bitcast %156 : vector<8x1xi32> -> vector<8x1xf32>
    %158 = tpu.concatenate %69, %117, %133, %149 in 0 : vector<8x16xf32>, vector<8x16xf32>, vector<8x16xf32>, vector<8x16xf32> -> vector<32x16xf32>
    %cst_95 = arith.constant dense<0.000000e+00> : vector<32x32xf32>
    %159 = tpu.matmul %158, %41, %cst_95 {dimension_numbers = #tpu.dot_dimension_numbers<[1], [0], [0], [1], [0, 0, 1, 1], [], []>} : vector<32x16xf32>, vector<16x32xf32>, vector<32x32xf32> -> vector<32x32xf32>
    %160 = vector.extract_strided_slice %159 {offsets = [0, 0], sizes = [8, 32], strides = [1, 1]} : vector<32x32xf32> to vector<8x32xf32>
    %161 = vector.extract_strided_slice %159 {offsets = [8, 0], sizes = [24, 32], strides = [1, 1]} : vector<32x32xf32> to vector<24x32xf32>
    %162 = tpu.concatenate %160, %160, %160 in 0 : vector<8x32xf32>, vector<8x32xf32>, vector<8x32xf32> -> vector<24x32xf32>
    %163 = arith.subf %162, %161 : vector<24x32xf32>
    %164 = arith.mulf %163, %163 : vector<24x32xf32>
    %cst_96 = arith.constant dense<0.000000e+00> : vector<24xf32>
    %165 = vector.multi_reduction <add>, %164, %cst_96 [1] : vector<24x32xf32> to vector<24xf32>
    %166 = vector.shape_cast %165 : vector<24xf32> to vector<24x1xf32>
    %167 = math.sqrt %166 : vector<24x1xf32>
    %cst_97 = arith.constant 1.000000e+00 : f32
    %168 = vector.broadcast %cst_97 : f32 to vector<8x1xf32>
    %169 = arith.subf %125, %141 : vector<8x1xf32>
    %170 = math.exp %169 : vector<8x1xf32>
    %171 = arith.subf %125, %157 : vector<8x1xf32>
    %172 = math.exp %171 : vector<8x1xf32>
    %173 = vector.extract_strided_slice %167 {offsets = [0, 0], sizes = [8, 1], strides = [1, 1]} : vector<24x1xf32> to vector<8x1xf32>
    %174 = arith.mulf %168, %173 : vector<8x1xf32>
    %175 = vector.extract_strided_slice %167 {offsets = [8, 0], sizes = [8, 1], strides = [1, 1]} : vector<24x1xf32> to vector<8x1xf32>
    %176 = arith.mulf %170, %175 : vector<8x1xf32>
    %177 = arith.addf %174, %176 : vector<8x1xf32>
    %178 = vector.extract_strided_slice %167 {offsets = [16, 0], sizes = [8, 1], strides = [1, 1]} : vector<24x1xf32> to vector<8x1xf32>
    %179 = arith.mulf %172, %178 : vector<8x1xf32>
    %180 = arith.addf %177, %179 : vector<8x1xf32>
    %181 = arith.addf %168, %170 : vector<8x1xf32>
    %182 = arith.addf %181, %172 : vector<8x1xf32>
    %183 = arith.divf %180, %182 : vector<8x1xf32>
    %184 = tpu.iota {dimensions = array<i32: 0>} : vector<8x1xi32>
    %c4_i32_98 = arith.constant 4 : i32
    %185 = vector.broadcast %c4_i32_98 : i32 to vector<8x1xi32>
    %186 = arith.cmpi slt, %184, %185 : vector<8x1xi32>
    %cst_99 = arith.constant 0.000000e+00 : f32
    %187 = vector.broadcast %cst_99 : f32 to vector<8x1xf32>
    %188 = arith.select %186, %183, %187 : vector<8x1xi1>, vector<8x1xf32>
    %cst_100 = arith.constant dense<0.000000e+00> : vector<8xf32>
    %189 = vector.multi_reduction <add>, %188, %cst_100 [1] : vector<8x1xf32> to vector<8xf32>
    %190 = vector.shape_cast %189 : vector<8xf32> to vector<8x1xf32>
    %cst_101 = arith.constant dense<0.000000e+00> : vector<1xf32>
    %191 = vector.multi_reduction <add>, %190, %cst_101 [0] : vector<8x1xf32> to vector<1xf32>
    %192 = vector.shape_cast %191 : vector<1xf32> to vector<1x1xf32>
    %193 = arith.addf %51, %192 : vector<1x1xf32>
    %cst_102 = arith.constant 1.000000e-01 : f32
    %194 = vector.broadcast %cst_102 : f32 to vector<1x1xf32>
    %195 = arith.mulf %194, %57 : vector<1x1xf32>
    %196 = arith.addf %193, %195 : vector<1x1xf32>
    %cst_103 = arith.constant 1.000000e-01 : f32
    %197 = vector.broadcast %cst_103 : f32 to vector<1x1xf32>
    %198 = arith.mulf %197, %63 : vector<1x1xf32>
    %199 = arith.addf %196, %198 : vector<1x1xf32>
    %c0_104 = arith.constant 0 : index
    %c0_105 = arith.constant 0 : index
    %200 = vector.load %arg8[%c0_104, %c0_105] : memref<1x1xf32, #tpu.memory_space<vmem>>, vector<1x1xf32>
    tpu.vector_store %arg8[%c0_104, %c0_105], %199 {strides = array<i32>} : memref<1x1xf32, #tpu.memory_space<vmem>>, vector<1x1xf32>,
    return
  }
  func.func @transform_0(%arg0: i32, %arg1: memref<8xi32, #tpu.memory_space<smem>>) -> (i32, i32) {
    %c0_i32 = arith.constant 0 : i32
    %c0_i32_0 = arith.constant 0 : i32
    %c0_i32_1 = arith.constant 0 : i32
    return %c0_i32, %c0_i32_0 : i32, i32
  }
  func.func @transform_1(%arg0: i32, %arg1: memref<8xi32, #tpu.memory_space<smem>>) -> (i32, i32) {
    %c0_i32 = arith.constant 0 : i32
    %c0_i32_0 = arith.constant 0 : i32
    %c0_i32_1 = arith.constant 0 : i32
    return %c0_i32, %c0_i32_0 : i32, i32
  }
  func.func @transform_2(%arg0: i32, %arg1: memref<8xi32, #tpu.memory_space<smem>>) -> (i32, i32) {
    %c0_i32 = arith.constant 0 : i32
    %c0_i32_0 = arith.constant 0 : i32
    %c0_i32_1 = arith.constant 0 : i32
    return %c0_i32, %c0_i32_0 : i32, i32
  }
  func.func @transform_3(%arg0: i32, %arg1: memref<8xi32, #tpu.memory_space<smem>>) -> (i32, i32) {
    %c0_i32 = arith.constant 0 : i32
    %c0_i32_0 = arith.constant 0 : i32
    %c0_i32_1 = arith.constant 0 : i32
    return %c0_i32, %c0_i32_0 : i32, i32
  }
  func.func @transform_4(%arg0: i32, %arg1: memref<8xi32, #tpu.memory_space<smem>>) -> (i32, i32) {
    %c0_i32 = arith.constant 0 : i32
    %c0_i32_0 = arith.constant 0 : i32
    %c0_i32_1 = arith.constant 0 : i32
    return %c0_i32, %c0_i32_0 : i32, i32
  }
  func.func @transform_6(%arg0: i32, %arg1: memref<8xi32, #tpu.memory_space<smem>>) -> (i32, i32) {
    %c0_i32 = arith.constant 0 : i32
    %c0_i32_0 = arith.constant 0 : i32
    %c0_i32_1 = arith.constant 0 : i32
    return %c0_i32, %c0_i32_0 : i32, i32
  }
}

</mosaic_0001>

<bundles_post_ra>
// kernel: tpu_custom_call.1
= control target key start
LH: loop header
LB: loop body
LE: loop exit
PB: predicated region body
PF: predicated region fallthrough
CT: control target
= control target key end

     0   :  { %s1343_s0 = inlined_call_operand.hbm [shape: s32[8], index: 0, kind: input, shape index: {}]   ;;  %s1344_s1 = inlined_call_operand.vmem [shape: s32[8,1], index: 1, kind: input, shape index: {}]   ;;  %s1345_s2 = inlined_call_operand.vmem [shape: f32[16,32], index: 2, kind: input, shape index: {}]   ;;  %s1346_s3 = inlined_call_operand.hbm [shape: f32[16,32], index: 3, kind: input, shape index: {}]   ;;  %s1347_s4 = inlined_call_operand.hbm [shape: f32[16,32], index: 4, kind: input, shape index: {}]   ;;  %s1348_s5 = inlined_call_operand.hbm [shape: f32[16,32], index: 5, kind: input, shape index: {}]   ;;  %s1349_s6 = inlined_call_operand.hbm [shape: f32[16,16], index: 6, kind: input, shape index: {}]   ;;  %s1350_s7 = inlined_call_operand.hbm [shape: f32[1,1], index: 7, kind: output, shape index: {}]  }
   0x1   :  { %s712_s26 = scalar_lea.hbm %s1343_s0, 16 }
   0x2   :  { %p713_p0 = scmp.ne.s32.totalorder %s1343_s0, %s712_s26  ;;  %p716_p1 = scmp.lt.u32.totalorder %s712_s26, %s1343_s0 }
   0x4   :  { %p718_p2 = pnand %p716_p1, %p713_p0 }
   0x6   :  { %721 = shalt.err (!%p718_p2)  }
   0x7   :  { %s1026_s8 = smov [#allocation5]  }
   0x8   :  { %13 = dma.hbm_to_smem %s1343_s0, 16, %s1026_s8, [#allocation4] }
   0x9   :  { %1002 = dma.done.wait [#allocation4], 16 }
   0xa   :  { %1003 = vsyncadd [#allocation4], 4294967280 }
   0xb   :  { %15 = sfence }
   0xc   :  { %16 = vsyncpa [#allocation7], 0 }
   0xd   :  { %17 = vsyncpa [#allocation10], 0 }
   0xe   :  { %18 = vsyncpa [#allocation8], 0  ;;  %s1027_s11 = smov [#allocation9]   ;;  %s1028_s13 = smov [#allocation6]  }
   0xf   :  { %s40_s12 = sshll.u32 %s1027_s11, 4  ;;  %s28_s14 = sshll.u32 %s1028_s13, 4  ;;  %s41_s12 = int_to_ptr.vmem [resolvable:$true] %s40_s12  ;;  %s1095_s14 = int_to_ptr.vmem [resolvable:$true] %s28_s14 }
  0x10   :  { %s722_s17 = scalar_lea.hbm %s1347_s4, 256 }
  0x11   :  { %p723_p3 = scmp.ne.s32.totalorder %s1347_s4, %s722_s17  ;;  %p726_p4 = scmp.lt.u32.totalorder %s722_s17, %s1347_s4 }
  0x13   :  { %p728_p5 = pnand %p726_p4, %p723_p3 }
  0x15   :  { %731 = shalt.err (!%p728_p5)
}
  0x16   :  { %s732_s21 = scalar_lea.vmem %s41_s12, 256  ;;  %p737_p7 = scmp.lt.s32.totalorder %s41_s12, %s41_s12 }
  0x17   :  { %p733_p6 = scmp.ne.s32.totalorder %s41_s12, %s732_s21  ;;  %p738_p8 = scmp.lt.s32.totalorder %s732_s21, %s732_s21 }
  0x19   :  { %p739_p9 = por %p738_p8, %p737_p7 }
  0x1b   :  { %p740_p10 = pnand %p739_p9, %p733_p6 }
  0x1d   :  { %743 = shalt.err (!%p740_p10)
}
  0x1e   :  { %s1029_s22 = smov 128   ;;  %s1030_s23 = smov 8  }
  0x1f   :  { %46 = dma.hbm_to_vmem [thread:$0]  %s1347_s4, 256, %s41_s12, [#allocation10], %s1029_s22, %s1029_s22, %s1030_s23  }
  0x20   :  { %s744_s28 = scalar_lea.hbm %s1346_s3, 256 }
  0x21   :  { %p745_p11 = scmp.ne.s32.totalorder %s1346_s3, %s744_s28  ;;  %p748_p12 = scmp.lt.u32.totalorder %s744_s28, %s1346_s3 }
  0x23   :  { %p750_p13 = pnand %p748_p12, %p745_p11 }
  0x25   :  { %753 = shalt.err (!%p750_p13)
}
  0x26   :  { %s754_s10 = scalar_lea.vmem %s1095_s14, 256  ;;  %p759_p1 = scmp.lt.s32.totalorder %s1095_s14, %s1095_s14 }
  0x27   :  { %p755_p0 = scmp.ne.s32.totalorder %s1095_s14, %s754_s10  ;;  %p760_p2 = scmp.lt.s32.totalorder %s754_s10, %s754_s10 }
  0x29   :  { %p761_p3 = por %p760_p2, %p759_p1 }
  0x2b   :  { %p762_p4 = pnand %p761_p3, %p755_p0 }
  0x2d   :  { %765 = shalt.err (!%p762_p4)
}
  0x2e   :  { %34 = dma.hbm_to_vmem [thread:$0]  %s1346_s3, 256, %s1095_s14, [#allocation7], %s1029_s22, %s1029_s22, %s1030_s23  }
  0x2f   :  { %s1031_s12 = smov [#allocation11]   ;;  %s766_s17 = scalar_lea.hbm %s1348_s5, 256 }
  0x30   :  { %s52_s13 = sshll.u32 %s1031_s12, 4  ;;  %p767_p5 = scmp.ne.s32.totalorder %s1348_s5, %s766_s17  ;;  %s53_s13 = int_to_ptr.vmem [resolvable:$true] %s52_s13 }
  0x31   :  { %p770_p6 = scmp.lt.u32.totalorder %s766_s17, %s1348_s5 }
  0x33   :  { %p772_p7 = pnand %p770_p6, %p767_p5 }
  0x35   :  { %775 = shalt.err (!%p772_p7)
}
  0x36   :  { %s776_s21 = scalar_lea.vmem %s53_s13, 256  ;;  %p781_p9 = scmp.lt.s32.totalorder %s53_s13, %s53_s13 }
  0x37   :  { %p777_p8 = scmp.ne.s32.totalorder %s53_s13, %s776_s21  ;;  %p782_p10 = scmp.lt.s32.totalorder %s776_s21, %s776_s21 }
  0x39   :  { %p783_p11 = por %p782_p10, %p781_p9 }
  0x3b   :  { %p784_p12 = pnand %p783_p11, %p777_p8 }
  0x3d   :  { %787 = shalt.err (!%p784_p12)
}
  0x3e   :  { %58 = dma.hbm_to_vmem [thread:$0]  %s1348_s5, 256, %s53_s13, [#allocation10], %s1029_s22, %s1029_s22, %s1030_s23  }
  0x3f   :  { %1004 = dma.done.wait [#allocation7], 256  }
  0x40   :  { %1005 = vsyncadd [#allocation7], 4294967040 }
  0x41   :  { %1006 = dma.done.wait [#allocation10], 512  }
  0x42   :  { %1007 = vsyncadd [#allocation10], 4294966784  ;;  %v1032_v0 = vmov 0   ;;  %v198_v1 = vld [vmem:[#allocation9] sm:$0xff]  ;;  %vm210_vm0 = vcmask 261120   ;;  %v1147_v2 = vld [vmem:[#allocation6] sm:$0xff] }
  0x43   :  { %695 = vset.pattern.permute.xlu0 %v1032_v0  ;;  %v194_v3 = vld [vmem:[%s1345_s2] sm:$0xff]  ;;  %v224_v4 = vmul.f32 %v198_v1, %v198_v1  ;;  %v246_v5 = vmul.f32 %v1147_v2, %v1147_v2  ;;  %v1155_v8 = vld [vmem:[#allocation6 + $0x8] sm:$0xff]  ;;  %v195_v9 = vld [vmem:[%s1345_s2 + $0x8] sm:$0xff]  ;;  %s68_s26 = sld [smem:[#allocation5]]  ;;  %s1172_s27 = sld [smem:[#allocation5 + $0x1]] }
  0x44   :  { %v202_v6 = vsub.f32 %v194_v3, %v1147_v2  ;;  %v199_v7 = vld [vmem:[#allocation9 + $0x8] sm:$0xff]  ;;  %v247_v11 = vmul.f32 %v1155_v8, %v1155_v8  ;;  %v203_v12 = vsub.f32 %v195_v9, %v1155_v8  ;;  %v200_v13 = vld [vmem:[#allocation11] sm:$0xff]  ;;  %v201_v16 = vld [vmem:[#allocation11 + $0x8] sm:$0xff]  ;;  %s1174_s28 = sld [smem:[#allocation5 + $0x2]]  ;;  %s1176_s29 = sld [smem:[#allocation5 + $0x3]] }
  0x45   :  { %v225_v10 = vmul.f32 %v199_v7, %v199_v7  ;;  %v226_v14 = vsel %vm210_vm0, %v224_v4, 0.0  ;;  %v248_v15 = vsel %vm210_vm0, %v246_v5, 0.0  ;;  %v270_v27 = vld [vmem:[%s1344_s1] sm:$0xff]  ;;  %s1178_s30 = sld [smem:[#allocation5 + $0x4]]  ;;  %s1180_s8 = sld [smem:[#allocation5 + $0x5]] }
  0x46   :  { %v204_v17 = vadd.f32 %v202_v6, %v198_v1  ;;  %227 = vadd.xlane.f32.xlu0 %v226_v14  ;;  %249 = vadd.xlane.f32.xlu1 %v248_v15  ;;  %v205_v18 = vadd.f32 %v203_v12, %v199_v7  ;;  %v251_v20 = vsel %vm210_vm0, %v247_v11, 0.0  ;;  %s1033_s10 = smov [#allocation2]   ;;  %s1190_s17 = scalar_lea.hbm %s1349_s6, 256 }
  0x47   :  { %v229_v19 = vsel %vm210_vm0, %v225_v10, 0.0  ;;  %s78_s4 = sshll.u32 %s1033_s10, 4  ;;  %s1185_s4 = int_to_ptr.vmem [resolvable:$true] %s78_s4 }
  0x48   :  { %v206_v21 = vmul.f32 %v204_v17, %v200_v13  ;;  %v207_v22 = vmul.f32 %v205_v18, %v201_v16 }
  0x49   :  { %s625_s9 = sshll.u32 %s68_s26, 4 }
  0x4a   :  { %v208_v23 = vmul.f32 %v206_v21, %v206_v21  ;;  %230 = vadd.xlane.f32.xlu0 %v229_v19  ;;  %252 = vadd.xlane.f32.xlu1 %v251_v20  ;;  %v209_v24 = vmul.f32 %v207_v22, %v207_v22  ;;  %s70_s13 = scalar_lea.hbm %s1349_s6, %s625_s9 }
  0x4b   :  { %s788_s1 = scalar_lea.hbm %s70_s13, 16  ;;  %p791_p0 = scmp.lt.u32.totalorder %s70_s13, %s1349_s6 }
  0x4c   :  { %v211_v25 = vsel %vm210_vm0, %v208_v23, 0.0  ;;  %v214_v26 = vsel %vm210_vm0, %v209_v24, 0.0  ;;  %p789_p13 = scmp.ne.s32.totalorder %s70_s13, %s788_s1  ;;  %p792_p1 = scmp.lt.u32.totalorder %s1190_s17, %s788_s1 }
  0x4d   :  { %p794_p3 = scmp.lt.u32.totalorder %s788_s1, %s70_s13 }
  0x4e   :  { %215 = vadd.xlane.f32.xlu1 %v214_v26  ;;  %212 = vadd.xlane.f32.xlu0 %v211_v25  ;;  %p793_p2 = por %p792_p1, %p791_p0 }
  0x50   :  { %p795_p4 = por %p794_p3, %p793_p2 }
  0x52   :  { %p796_p5 = pnand %p795_p4, %p789_p13 }
  0x64   :  { %272 = vperm.xlu0 %695, %v270_v27  }
  0x65   :  { %799 = shalt.err (!%p796_p5)  }
  0x66   :  { %s800_s0 = scalar_lea.vmem %s1185_s4, 16  ;;  %s1199_s20 = scalar_lea.vmem %s1185_s4, 128 }
  0x67   :  { %p801_p6 = scmp.ne.s32.totalorder %s1185_s4, %s800_s0  ;;  %p805_p7 = scmp.lt.s32.totalorder %s1185_s4, %s1185_s4 }
  0x68   :  { %p806_p8 = scmp.lt.s32.totalorder %s1199_s20, %s800_s0 }
  0x6a   :  { %p807_p9 = por %p806_p8, %p805_p7 }
  0x6c   :  { %p808_p10 = pnand %p807_p9, %p801_p6 }
  0x6e   :  { %811 = shalt.err (!%p808_p10)  }
  0x6f   :  { %81 = dma.hbm_to_vmem [thread:$0]  %s70_s13, 16, %s1185_s4, [#allocation3] }
  0x70   :  { %s627_s21 = sshll.u32 %s1172_s27, 4  ;;  %s1034_s25 = smov [#allocation2 + $0x1]  }
  0x71   :  { %s84_s24 = scalar_lea.hbm %s1349_s6, %s627_s21  ;;  %s94_s5 = sshll.u32 %s1034_s25, 4  ;;  %s95_s5 = int_to_ptr.vmem [resolvable:$true] %s94_s5 }
  0x72   :  { %s629_s22 = sshll.u32 %s1174_s28, 4  ;;  %s812_s2 = scalar_lea.hbm %s84_s24, 16 }
  0x73   :  { %p813_p11 = scmp.ne.s32.totalorder %s84_s24, %s812_s2  ;;  %p815_p12 = scmp.lt.u32.totalorder %s84_s24, %s1349_s6 }
  0x74   :  { %p816_p13 = scmp.lt.u32.totalorder %s1190_s17, %s812_s2  ;;  %p818_p1 = scmp.lt.u32.totalorder %s812_s2, %s84_s24 }
  0x76   :  { %p817_p0 = por %p816_p13, %p815_p12 }
  0x78   :  { %p819_p2 = por %p818_p1, %p817_p0 }
  0x7a   :  { %p820_p3 = pnand %p819_p2, %p813_p11 }
  0x7c   :  { %823 = shalt.err (!%p820_p3)  }
  0x7d   :  { %s824_s27 = scalar_lea.vmem %s95_s5, 16  ;;  %p829_p5 = scmp.lt.s32.totalorder %s95_s5, %s1185_s4 }
  0x7e   :  { %p825_p4 = scmp.ne.s32.totalorder %s95_s5, %s824_s27  ;;  %p830_p6 = scmp.lt.s32.totalorder %s1199_s20, %s824_s27 }
  0x80   :  { %p831_p7 = por %p830_p6, %p829_p5 }
  0x82   :  { %p832_p8 = pnand %p831_p7, %p825_p4 }
  0x84   :  { %835 = shalt.err (!%p832_p8)  }
  0x85   :  { %97 = dma.hbm_to_vmem [thread:$0]  %s84_s24, 16, %s95_s5, [#allocation3 + $0x1] }
  0x86   :  { %s100_s10 = scalar_lea.hbm %s1349_s6, %s629_s22  ;;  %s1035_s11 = smov [#allocation2 + $0x2]  }
  0x87   :  { %s110_s12 = sshll.u32 %s1035_s11, 4  ;;  %s631_s13 = sshll.u32 %s1176_s29, 4  ;;  %s111_s12 = int_to_ptr.vmem [resolvable:$true] %s110_s12 }
  0x88   :  { %s1223_s16 = scalar_lea.hbm %s1349_s6, %s631_s13  ;;  %s836_s18 = scalar_lea.hbm %s100_s10, 16 }
  0x89   :  { %p837_p9 = scmp.ne.s32.totalorder %s100_s10, %s836_s18  ;;  %p839_p10 = scmp.lt.u32.totalorder %s100_s10, %s1349_s6 }
  0x8a   :  { %p840_p11 = scmp.lt.u32.totalorder %s1190_s17, %s836_s18  ;;  %p842_p13 = scmp.lt.u32.totalorder %s836_s18, %s100_s10 }
  0x8c   :  { %p841_p12 = por %p840_p11, %p839_p10 }
  0x8e   :  { %p843_p0 = por %p842_p13, %p841_p12 }
  0x90   :  { %p844_p1 = pnand %p843_p0, %p837_p9 }
  0x92   :  { %847 = shalt.err (!%p844_p1)  }
  0x93   :  { %s848_s21 = scalar_lea.vmem %s111_s12, 16  ;;  %p853_p3 = scmp.lt.s32.totalorder %s111_s12, %s1185_s4 }
  0x94   :  { %p849_p2 = scmp.ne.s32.totalorder %s111_s12, %s848_s21  ;;  %p854_p4 = scmp.lt.s32.totalorder %s1199_s20, %s848_s21 }
  0x96   :  { %p855_p5 = por %p854_p4, %p853_p3 }
  0x98   :  { %p856_p6 = pnand %p855_p5, %p849_p2 }
  0x9a   :  { %859 = shalt.err (!%p856_p6)  }
  0x9b   :  { %113 = dma.hbm_to_vmem [thread:$0]  %s100_s10, 16, %s111_s12, [#allocation3 + $0x2] }
  0x9c   :  { %s633_s29 = sshll.u32 %s1178_s30, 4  ;;  %s1036_s3 = smov [#allocation2 + $0x3]  }
  0x9d   :  { %s126_s14 = sshll.u32 %s1036_s3, 4  ;;  %s1235_s5 = scalar_lea.hbm %s1349_s6, %s633_s29  ;;  %s127_s14 = int_to_ptr.vmem [resolvable:$true] %s126_s14 }
  0x9e   :  { %s860_s22 = scalar_lea.hbm %s1223_s16, 16  ;;  %p863_p8 = scmp.lt.u32.totalorder %s1223_s16, %s1349_s6 }
  0x9f   :  { %p861_p7 = scmp.ne.s32.totalorder %s1223_s16, %s860_s22  ;;  %p864_p9 = scmp.lt.u32.totalorder %s1190_s17, %s860_s22 }
  0xa0   :  { %p866_p11 = scmp.lt.u32.totalorder %s860_s22, %s1223_s16 }
  0xa1   :  { %p865_p10 = por %p864_p9, %p863_p8 }
  0xa3   :  { %p867_p12 = por %p866_p11, %p865_p10 }
  0xa5   :  { %p868_p13 = pnand %p867_p12, %p861_p7 }
  0xa7   :  { %871 = shalt.err (!%p868_p13)  }
  0xa8   :  { %s872_s30 = scalar_lea.vmem %s127_s14, 16  ;;  %p877_p1 = scmp.lt.s32.totalorder %s127_s14, %s1185_s4 }
  0xa9   :  { %p873_p0 = scmp.ne.s32.totalorder %s127_s14, %s872_s30  ;;  %p878_p2 = scmp.lt.s32.totalorder %s1199_s20, %s872_s30 }
  0xab   :  { %p879_p3 = por %p878_p2, %p877_p1 }
  0xad   :  { %p880_p4 = pnand %p879_p3, %p873_p0 }
  0xaf   :  { %883 = shalt.err (!%p880_p4)  }
  0xb0   :  { %129 = dma.hbm_to_vmem [thread:$0]  %s1223_s16, 16, %s127_s14, [#allocation3 + $0x3] }
  0xb1   :  { %s1037_s26 = smov [#allocation2 + $0x4]   ;;  %s635_s28 = sshll.u32 %s1180_s8, 4 }
  0xb2   :  { %s142_s27 = sshll.u32 %s1037_s26, 4  ;;  %s1252_s11 = scalar_lea.hbm %s1349_s6, %s635_s28  ;;  %s143_s27 = int_to_ptr.vmem [resolvable:$true] %s142_s27 }
  0xb3   :  { %s884_s12 = scalar_lea.hbm %s1235_s5, 16  ;;  %p887_p6 = scmp.lt.u32.totalorder %s1235_s5, %s1349_s6 }
  0xb4   :  { %p885_p5 = scmp.ne.s32.totalorder %s1235_s5, %s884_s12  ;;  %p888_p7 = scmp.lt.u32.totalorder %s1190_s17, %s884_s12 }
  0xb5   :  { %p890_p9 = scmp.lt.u32.totalorder %s884_s12, %s1235_s5 }
  0xb6   :  { %p889_p8 = por %p888_p7, %p887_p6 }
  0xb8   :  { %p891_p10 = por %p890_p9, %p889_p8 }
  0xba   :  { %p892_p11 = pnand %p891_p10, %p885_p5 }
  0xbc   :  { %895 = shalt.err (!%p892_p11)  }
  0xbd   :  { %s896_s15 = scalar_lea.vmem %s143_s27, 16  ;;  %p901_p13 = scmp.lt.s32.totalorder %s143_s27, %s1185_s4 }
  0xbe   :  { %p897_p12 = scmp.ne.s32.totalorder %s143_s27, %s896_s15  ;;  %p902_p0 = scmp.lt.s32.totalorder %s1199_s20, %s896_s15 }
  0xc0   :  { %p903_p1 = por %p902_p0, %p901_p13 }
  0xc2   :  { %p904_p2 = pnand %p903_p1, %p897_p12 }
  0xc4   :  { %907 = shalt.err (!%p904_p2)  }
  0xc5   :  { %145 = dma.hbm_to_vmem [thread:$0]  %s1235_s5, 16, %s143_s27, [#allocation3 + $0x4] }
  0xc6   :  { %s1265_s8 = sld [smem:[#allocation5 + $0x6]]  ;;  %s1038_s16 = smov [#allocation2 + $0x5]  }
  0xc7   :  { %s158_s18 = sshll.u32 %s1038_s16, 4  ;;  %s1039_s19 = smov [#allocation2 + $0x6]   ;;  %s159_s18 = int_to_ptr.vmem [resolvable:$true] %s158_s18 }
  0xc8   :  { %s174_s0 = sshll.u32 %s1039_s19, 4  ;;  %s908_s21 = scalar_lea.hbm %s1252_s11, 16  ;;  %s175_s0 = int_to_ptr.vmem [resolvable:$true] %s174_s0 }
  0xc9   :  { %p909_p3 = scmp.ne.s32.totalorder %s1252_s11, %s908_s21  ;;  %p911_p4 = scmp.lt.u32.totalorder %s1252_s11, %s1349_s6 }
  0xca   :  { %p912_p5 = scmp.lt.u32.totalorder %s1190_s17, %s908_s21  ;;  %p914_p7 = scmp.lt.u32.totalorder %s908_s21, %s1252_s11 }
  0xcc   :  { %p913_p6 = por %p912_p5, %p911_p4 }
  0xce   :  { %p915_p8 = por %p914_p7, %p913_p6 }
  0xd0   :  { %p916_p9 = pnand %p915_p8, %p909_p3 }
  0xd2   :  { %919 = shalt.err (!%p916_p9)  }
  0xd3   :  { %s920_s14 = scalar_lea.vmem %s159_s18, 16  ;;  %p925_p11 = scmp.lt.s32.totalorder %s159_s18, %s1185_s4 }
  0xd4   :  { %p921_p10 = scmp.ne.s32.totalorder %s159_s18, %s920_s14  ;;  %p926_p12 = scmp.lt.s32.totalorder %s1199_s20, %s920_s14 }
  0xd6   :  { %p927_p13 = por %p926_p12, %p925_p11 }
  0xd8   :  { %p928_p0 = pnand %p927_p13, %p921_p10 }
  0xda   :  { %931 = shalt.err (!%p928_p0)  }
  0xdb   :  { %161 = dma.hbm_to_vmem [thread:$0]  %s1252_s11, 16, %s159_s18, [#allocation3 + $0x5] }
  0xdc   :  { %s638_s24 = sld [smem:[#allocation5 + $0x7]]  ;;  %s637_s25 = sshll.u32 %s1265_s8, 4 }
  0xdd   :  { %s1040_s5 = smov [#allocation2 + $0x7]   ;;  %s164_s30 = scalar_lea.hbm %s1349_s6, %s637_s25 }
  0xde   :  { %s190_s22 = sshll.u32 %s1040_s5, 4  ;;  %s932_s26 = scalar_lea.hbm %s164_s30, 16  ;;  %s191_s22 = int_to_ptr.vmem [resolvable:$true] %s190_s22 }
  0xdf   :  { %p933_p1 = scmp.ne.s32.totalorder %s164_s30, %s932_s26  ;;  %p935_p2 = scmp.lt.u32.totalorder %s164_s30, %s1349_s6 }
  0xe0   :  { %p936_p3 = scmp.lt.u32.totalorder %s1190_s17, %s932_s26  ;;  %p938_p5 = scmp.lt.u32.totalorder %s932_s26, %s164_s30 }
  0xe2   :  { %p937_p4 = por %p936_p3, %p935_p2 }
  0xe4   :  { %p939_p6 = por %p938_p5, %p937_p4 }
  0xe6   :  { %p940_p7 = pnand %p939_p6, %p933_p1 }
  0xe8   :  { %943 = shalt.err (!%p940_p7)  }
  0xe9   :  { %s944_s9 = scalar_lea.vmem %s175_s0, 16  ;;  %p949_p9 = scmp.lt.s32.totalorder %s175_s0, %s1185_s4 }
  0xea   :  { %p945_p8 = scmp.ne.s32.totalorder %s175_s0, %s944_s9  ;;  %p950_p10 = scmp.lt.s32.totalorder %s1199_s20, %s944_s9 }
  0xec   :  { %p951_p11 = por %p950_p10, %p949_p9 }
  0xee   :  { %p952_p12 = pnand %p951_p11, %p945_p8 }
  0xf0   :  { %955 = shalt.err (!%p952_p12)  }
  0xf1   :  { %177 = dma.hbm_to_vmem [thread:$0]  %s164_s30, 16, %s175_s0, [#allocation3 + $0x6] }
  0xf2   :  { %s639_s10 = sshll.u32 %s638_s24, 4 }
  0xf3   :  { %s180_s13 = scalar_lea.hbm %s1349_s6, %s639_s10 }
  0xf4   :  { %s956_s1 = scalar_lea.hbm %s180_s13, 16  ;;  %p959_p0 = scmp.lt.u32.totalorder %s180_s13, %s1349_s6 }
  0xf5   :  { %p957_p13 = scmp.ne.s32.totalorder %s180_s13, %s956_s1  ;;  %p960_p1 = scmp.lt.u32.totalorder %s1190_s17, %s956_s1 }
  0xf6   :  { %p962_p3 = scmp.lt.u32.totalorder %s956_s1, %s180_s13 }
  0xf7   :  { %p961_p2 = por %p960_p1, %p959_p0 }
  0xf9   :  { %p963_p4 = por %p962_p3, %p961_p2 }
  0xfb   :  { %p964_p5 = pnand %p963_p4, %p957_p13 }
  0xfd   :  { %967 = shalt.err (!%p964_p5)  }
  0xfe   :  { %s968_s16 = scalar_lea.vmem %s191_s22, 16  ;;  %p973_p7 = scmp.lt.s32.totalorder %s191_s22, %s1185_s4 }
  0xff   :  { %p969_p6 = scmp.ne.s32.totalorder %s191_s22, %s968_s16  ;;  %p974_p8 = scmp.lt.s32.totalorder %s1199_s20, %s968_s16 }
 0x101   :  { %p975_p9 = por %p974_p8, %p973_p7 }
 0x103   :  { %p976_p10 = pnand %p975_p9, %p969_p6 }
 0x105   :  { %979 = shalt.err (!%p976_p10)  }
 0x106   :  { %193 = dma.hbm_to_vmem [thread:$0]  %s180_s13, 16, %s191_s22, [#allocation3 + $0x7]  ;;  %v228_v28 = vpop.xlane.xlu0 %227  ;;  %v250_v29 = vpop.xlane.xlu1 %249  ;;  %v268_v41 = vlaneseq  ;;  %v1041_v56 = vmov 0.0  }
 0x108   :  { %v269_v48 = vand.u32 127, %v268_v41 }
 0x10a   :  { %v231_v30 = vpop.xlane.xlu0 %230  ;;  %v253_v31 = vpop.xlane.xlu1 %252 }
 0x10b   :  { %v232_v32 = vadd.f32 %v231_v30, %v228_v28  ;;  %v254_v33 = vadd.f32 %v253_v31, %v250_v29 }
 0x10d   :  { %v233_v34 = vrot.slane %v232_v32, 4  ;;  %v255_v35 = vrot.slane %v254_v33, 4 }
 0x10e   :  { %v216_v36 = vpop.xlane.xlu1 %215  ;;  %v213_v37 = vpop.xlane.xlu0 %212 }
 0x10f   :  { %v234_v38 = vadd.f32 %v233_v34, %v232_v32  ;;  %v256_v39 = vadd.f32 %v255_v35, %v254_v33  ;;  %v217_v40 = vadd.f32 %v216_v36, %v213_v37 }
 0x111   :  { %v235_v42 = vrot.slane %v234_v38, 2  ;;  %v257_v43 = vrot.slane %v256_v39, 2  ;;  %v218_v44 = vrot.slane %v217_v40, 4 }
 0x112   :  { %v273_v52 = vpop.permute.xlu0 %272 }
 0x113   :  { %v236_v45 = vadd.f32 %v235_v42, %v234_v38  ;;  %v258_v46 = vadd.f32 %v257_v43, %v256_v39  ;;  %v219_v47 = vadd.f32 %v218_v44, %v217_v40  ;;  %vm274_vm1 = vcmp.eq.s32.totalorder %v269_v48, %v273_v52 }
 0x114   :  { %v640_v57 = vsel %vm274_vm1, 1.0, %v1041_v56 }
 0x115   :  { %v237_v49 = vrot.slane %v236_v45, 1  ;;  %v259_v50 = vrot.slane %v258_v46, 1  ;;  %v220_v51 = vrot.slane %v219_v47, 2 }
 0x117   :  { %v238_v53 = vadd.f32 %v237_v49, %v236_v45  ;;  %v260_v54 = vadd.f32 %v259_v50, %v258_v46  ;;  %v221_v55 = vadd.f32 %v220_v51, %v219_v47 }
 0x119   :  { %696 = vrsqrt.f32 %v238_v53  ;;  %v222_v58 = vrot.slane %v221_v55, 1  ;;  %vm241_vm2 = vcmp.eq.f32.partialorder %v238_v53, inf  ;;  %v244_v63 = vand.u32 2147483648, %v238_v53 }
 0x11a   :  { %698 = vrsqrt.f32 %v260_v54  ;;  %vm243_vm3 = vcmp.eq.f32.partialorder %v238_v53, 0.0  ;;  %vm263_vm4 = vcmp.eq.f32.partialorder %v260_v54, inf  ;;  %v266_v3 = vand.u32 2147483648, %v260_v54 }
 0x11b   :  { %v1299_v59 = vadd.f32 %v222_v58, %v221_v55  ;;  %vm265_vm5 = vcmp.eq.f32.partialorder %v260_v54, 0.0 }
 0x123   :  { %v697_v60 = vpop.eup %696 }
 0x124   :  { %v699_v61 = vpop.eup %698  ;;  %v240_v62 = vmul.f32 %v697_v60, %v238_v53 }
 0x125   :  { %v262_v0 = vmul.f32 %v699_v61, %v260_v54 }
 0x126   :  { %v242_v1 = vsel %vm241_vm2, %v238_v53, %v240_v62 }
 0x127   :  { %v1301_v4 = vsel %vm243_vm3, %v244_v63, %v242_v1  ;;  %v264_v5 = vsel %vm263_vm4, %v260_v54, %v262_v0 }
 0x128   :  { %v1303_v6 = vsel %vm265_vm5, %v266_v3, %v264_v5 }
 0x129   :  { %1008 = dma.done.wait [#allocation3], 16 }
 0x12a   :  { %1009 = vsyncadd [#allocation3], 4294967280 }
 0x12b   :  { %1010 = dma.done.wait [#allocation3 + $0x1], 16 }
 0x12c   :  { %1011 = vsyncadd [#allocation3 + $0x1], 4294967280 }
 0x12d   :  { %1012 = dma.done.wait [#allocation3 + $0x2], 16 }
 0x12e   :  { %1013 = vsyncadd [#allocation3 + $0x2], 4294967280 }
 0x12f   :  { %1014 = dma.done.wait [#allocation3 + $0x3], 16 }
 0x130   :  { %1015 = vsyncadd [#allocation3 + $0x3], 4294967280 }
 0x131   :  { %1016 = dma.done.wait [#allocation3 + $0x4], 16 }
 0x132   :  { %1017 = vsyncadd [#allocation3 + $0x4], 4294967280 }
 0x133   :  { %1018 = dma.done.wait [#allocation3 + $0x5], 16 }
 0x134   :  { %1019 = vsyncadd [#allocation3 + $0x5], 4294967280 }
 0x135   :  { %1020 = dma.done.wait [#allocation3 + $0x6], 16 }
 0x136   :  { %1021 = vsyncadd [#allocation3 + $0x6], 4294967280 }
 0x137   :  { %1022 = dma.done.wait [#allocation3 + $0x7], 16 }
 0x138   :  { %1023 = vsyncadd [#allocation3 + $0x7], 4294967280  ;;  %vm301_vm6 = vcmask 130048   ;;  %v294_v7 = vld [vmem:[#allocation2] sm:$0xff]  ;;  %v672_v21 = vpack.c.bf16 %v1155_v8, %v1147_v2  ;;  %s1042_s6 = smov [#allocation12]   ;;  %vm536_vm4 = vcmask 0  }
 0x139   :  { %666 = vmatprep.mubr.msk.f32.mxu0 %vm301_vm6, %v640_v57  ;;  %v296_v9 = vshra.s32 %v294_v7, 31  ;;  %s544_s4 = sshll.u32 %s1042_s6, 4  ;;  %s545_s4 = int_to_ptr.vmem [resolvable:$true] %s544_s4 }
 0x13a   :  { %673 = vmatprep.subr.bf16.mxu0 %v672_v21  ;;  %676 = vmatprep.subr.bf16.mxu1 %v672_v21  ;;  %s980_s17 = scalar_lea.vmem %s545_s4, 16  ;;  %s984_s20 = scalar_lea.vmem %s545_s4, 32 }
 0x13b   :  { %v297_v10 = vand.u32 2147483647, %v296_v9  ;;  %675 = vmatpush3.bf16.msra.mxu0 %v672_v21  ;;  %677 = vmatpush3.bf16.msra.mxu1 %v672_v21  ;;  %p981_p11 = scmp.ne.s32.totalorder %s545_s4, %s980_s17  ;;  %p985_p12 = scmp.lt.s32.totalorder %s545_s4, %s545_s4 }
 0x13c   :  { %p986_p13 = scmp.lt.s32.totalorder %s984_s20, %s980_s17 }
 0x13d   :  { %v298_v11 = vxor.u32 %v297_v10, %v294_v7 }
 0x13e   :  { %p987_p0 = por %p986_p13, %p985_p12 }
 0x13f   :  { %v299_v12 = vand.u32 4294967280, %v298_v11 }
 0x140   :  { %p988_p1 = pnand %p987_p0, %p981_p11 }
 0x141   :  { %v1306_v13 = vor.u32 %v299_v12, %v269_v48 }
 0x143   :  { %v302_v14 = vsel %vm301_vm6, %v1306_v13, 2147483647 }
 0x144   :  { %v304_v15 = vshra.s32 %v302_v14, 16  ;;  %v303_v17 = vand.u32 65535, %v302_v14 }
 0x146   :  { %v306_v16 = vcvt.s32.f32 %v304_v15  ;;  %v305_v18 = vcvt.s32.f32 %v303_v17 }
 0x148   :  { %307 = vmin.xlane.f32.xlu0 %v306_v16 }
 0x1d5   :  { %v308_v19 = vpop.xlane.xlu0 %307 }
 0x1d6   :  { %vm309_vm7 = vcmp.eq.f32.partialorder %v306_v16, %v308_v19  ;;  %v314_v22 = vcvt.f32.s32 %v308_v19 }
 0x1d7   :  { %v310_v20 = vsel %vm309_vm7, %v305_v18, inf }
 0x1d8   :  { %311 = vmin.xlane.f32.xlu0 %v310_v20  ;;  %v315_v24 = vshll.u32 %v314_v22, 16 }
 0x265   :  { %v312_v23 = vpop.xlane.xlu0 %311 }
 0x266   :  { %v313_v25 = vcvt.f32.s32 %v312_v23 }
 0x268   :  { %v316_v26 = vadd.s32 %v315_v24, %v313_v25 }
 0x26a   :  { %vm317_vm8 = vcmp.eq.s32.totalorder %v1306_v13, %v316_v26  ;;  %v320_v38 = vand.u32 4294967280, %v316_v26 }
 0x26b   :  { %v641_v27 = vsel %vm317_vm8, 1.0, %v1041_v56  ;;  %v325_v28 = vsel %vm317_vm8, 2147483647, %v1306_v13 }
 0x26c   :  { %667 = vmatmul.mubr.msk.f32.vlgmr.msra.gmra.mrb[0].mxu0 %vm301_vm6, %v641_v27  ;;  %v326_v29 = vsel %vm301_vm6, %v325_v28, 2147483647  ;;  %v321_v43 = vshra.s32 %v320_v38, 31 }
 0x26d   :  { %v328_v2 = vshra.s32 %v326_v29, 16  ;;  %v327_v30 = vand.u32 65535, %v326_v29 }
 0x26e   :  { %v322_v48 = vand.u32 2147483647, %v321_v43 }
 0x26f   :  { %v330_v8 = vcvt.s32.f32 %v328_v2  ;;  %v329_v32 = vcvt.s32.f32 %v327_v30 }
 0x270   :  { %v323_v54 = vxor.u32 %v322_v48, %v320_v38 }
 0x271   :  { %331 = vmin.xlane.f32.xlu1 %v330_v8 }
 0x2fe   :  { %v332_v31 = vpop.xlane.xlu1 %331 }
 0x2ff   :  { %vm333_vm9 = vcmp.eq.f32.partialorder %v330_v8, %v332_v31  ;;  %v338_v37 = vcvt.f32.s32 %v332_v31 }
 0x300   :  { %v334_v33 = vsel %vm333_vm9, %v329_v32, inf }
 0x301   :  { %335 = vmin.xlane.f32.xlu1 %v334_v33  ;;  %v339_v40 = vshll.u32 %v338_v37, 16 }
 0x33f   :  { %v668_v34 = vpop.f32.mrb[0].mxu0 }
 0x340   :  { %v451_v35 = vpop.f32.mrb[1].mxu0 }
 0x341   :  { %v470_v36 = vsub.f32 %v451_v35, %v668_v34 }
 0x343   :  { %v473_v63 = vmul.f32 %v470_v36, %v470_v36 }
 0x345   :  { %v476_v0 = vsel %vm210_vm0, %v473_v63, 0.0 }
 0x38e   :  { %v336_v39 = vpop.xlane.xlu1 %335 }
 0x38f   :  { %v337_v42 = vcvt.f32.s32 %v336_v39 }
 0x391   :  { %v340_v44 = vadd.s32 %v339_v40, %v337_v42 }
 0x393   :  { %v344_v45 = vand.u32 4294967280, %v340_v44  ;;  %vm341_vm10 = vcmp.eq.s32.totalorder %v1306_v13, %v340_v44 }
 0x394   :  { %v642_v46 = vsel %vm341_vm10, 1.0, %v1041_v56  ;;  %v349_v47 = vsel %vm341_vm10, 2147483647, %v325_v28 }
 0x395   :  { %v345_v49 = vshra.s32 %v344_v45, 31  ;;  %669 = vmatprep.mubr.msk.f32.mxu1 %vm301_vm6, %v642_v46  ;;  %v350_v50 = vsel %vm301_vm6, %v349_v47, 2147483647  ;;  %v521_v47 = vshrl.u32 %v268_v41, 7 }
 0x396   :  { %v352_v51 = vshra.s32 %v350_v50, 16  ;;  %v351_v58 = vand.u32 65535, %v350_v50 }
 0x397   :  { %v346_v52 = vand.u32 2147483647, %v345_v49  ;;  %vm522_vm3 = vcmp.lt.s32.totalorder %v521_v47, 4 }
 0x398   :  { %v354_v53 = vcvt.s32.f32 %v352_v51  ;;  %v353_v61 = vcvt.s32.f32 %v351_v58 }
 0x399   :  { %v347_v55 = vxor.u32 %v346_v52, %v344_v45 }
 0x39a   :  { %355 = vmin.xlane.f32.xlu0 %v354_v53 }
 0x39b   :  { %v506_v57 = vsub.f32 %v323_v54, %v347_v55 }
 0x39d   :  { %v507_v14 = vmul.f32 1.442695, %v506_v57 }
 0x39f   :  { %700 = vpow2.f32 %v507_v14 }
 0x3a9   :  { %v701_v19 = vpop.eup %700 }
 0x3aa   :  { %v516_v20 = vadd.f32 1.0, %v701_v19 }
 0x427   :  { %v356_v60 = vpop.xlane.xlu0 %355 }
 0x428   :  { %vm357_vm11 = vcmp.eq.f32.partialorder %v354_v53, %v356_v60  ;;  %v362_v1 = vcvt.f32.s32 %v356_v60 }
 0x429   :  { %v358_v62 = vsel %vm357_vm11, %v353_v61, inf }
 0x42a   :  { %359 = vmin.xlane.f32.xlu1 %v358_v62  ;;  %v363_v5 = vshll.u32 %v362_v1, 16  ;;  %v532_v62 = vmul.f32 0.1, %v1301_v4 }
 0x42e   :  { %477 = vadd.xlane.f32.xlu1 %v476_v0  ;;  %v534_v0 = vmul.f32 0.1, %v1303_v6 }
 0x4b7   :  { %v360_v3 = vpop.xlane.xlu1 %359 }
 0x4b8   :  { %v361_v7 = vcvt.f32.s32 %v360_v3 }
 0x4ba   :  { %v364_v9 = vadd.s32 %v363_v5, %v361_v7 }
 0x4bb   :  { %v478_v29 = vpop.xlane.xlu1 %477 }
 0x4bc   :  { %v368_v10 = vand.u32 4294967280, %v364_v9  ;;  %vm365_vm12 = vcmp.eq.s32.totalorder %v1306_v13, %v364_v9  ;;  %vm487_vm15 = vcmp.eq.f32.partialorder %v478_v29, inf  ;;  %v490_v42 = vand.u32 2147483648, %v478_v29 }
 0x4bd   :  { %v643_v12 = vsel %vm365_vm12, 1.0, %v1041_v56  ;;  %vm489_vm1 = vcmp.eq.f32.partialorder %v478_v29, 0.0 }
 0x4be   :  { %v369_v11 = vshra.s32 %v368_v10, 31  ;;  %670 = vmatmul.mubr.msk.f32.vlgmr.msra.gmra.mrb[0].mxu1 %vm301_vm6, %v643_v12 }
 0x4c0   :  { %v370_v15 = vand.u32 2147483647, %v369_v11 }
 0x4c2   :  { %v371_v16 = vxor.u32 %v370_v15, %v368_v10 }
 0x4c4   :  { %v509_v17 = vsub.f32 %v323_v54, %v371_v16 }
 0x4c6   :  { %v510_v18 = vmul.f32 1.442695, %v509_v17 }
 0x4c8   :  { %702 = vpow2.f32 %v510_v18 }
 0x4c9   :  { %704 = vrsqrt.f32 %v478_v29 }
 0x4d2   :  { %v703_v21 = vpop.eup %702 }
 0x4d3   :  { %v517_v22 = vadd.f32 %v703_v21, %v516_v20  ;;  %v705_v30 = vpop.eup %704 }
 0x4d4   :  { %v486_v32 = vmul.f32 %v705_v30, %v478_v29 }
 0x4d6   :  { %v488_v38 = vsel %vm487_vm15, %v478_v29, %v486_v32 }
 0x4d7   :  { %v491_v45 = vsel %vm489_vm1, %v490_v42, %v488_v38 }
 0x591   :  { %v671_v23 = vpop.f32.mrb[0].mxu1 }
 0x592   :  { %v472_v24 = vsub.f32 %v451_v35, %v671_v23  ;;  %v461_v25 = vpop.f32.mrb[1].mxu1 }
 0x593   :  { %v471_v13 = vsub.f32 %v451_v35, %v461_v25 }
 0x594   :  { %v475_v27 = vmul.f32 %v472_v24, %v472_v24 }
 0x595   :  { %v474_v26 = vmul.f32 %v471_v13, %v471_v13 }
 0x596   :  { %v482_v28 = vsel %vm210_vm0, %v475_v27, 0.0 }
 0x597   :  { %v479_v56 = vsel %vm210_vm0, %v474_v26, 0.0 }
 0x598   :  { %480 = vadd.xlane.f32.xlu0 %v479_v56 }
 0x59c   :  { %483 = vadd.xlane.f32.xlu0 %v482_v28 }
 0x625   :  { %v481_v2 = vpop.xlane.xlu0 %480 }
 0x626   :  { %706 = vrsqrt.f32 %v481_v2  ;;  %vm494_vm13 = vcmp.eq.f32.partialorder %v481_v2, inf  ;;  %v497_v34 = vand.u32 2147483648, %v481_v2  ;;  %vm496_vm14 = vcmp.eq.f32.partialorder %v481_v2, 0.0 }
 0x629   :  { %v484_v8 = vpop.xlane.xlu0 %483 }
 0x62a   :  { %708 = vrsqrt.f32 %v484_v8  ;;  %vm501_vm0 = vcmp.eq.f32.partialorder %v484_v8, inf  ;;  %v504_v43 = vand.u32 2147483648, %v484_v8  ;;  %vm503_vm2 = vcmp.eq.f32.partialorder %v484_v8, 0.0 }
 0x62b   :  { %710 = vrcp.f32 %v517_v22 }
 0x630   :  { %v707_v31 = vpop.eup %706 }
 0x631   :  { %v493_v33 = vmul.f32 %v707_v31, %v481_v2 }
 0x633   :  { %v495_v35 = vsel %vm494_vm13, %v481_v2, %v493_v33 }
 0x634   :  { %v709_v36 = vpop.eup %708  ;;  %v498_v37 = vsel %vm496_vm14, %v497_v34, %v495_v35 }
 0x635   :  { %v512_v39 = vmul.f32 %v701_v19, %v498_v37  ;;  %v500_v40 = vmul.f32 %v709_v36, %v484_v8  ;;  %v711_v51 = vpop.eup %710 }
 0x637   :  { %v502_v44 = vsel %vm501_vm0, %v484_v8, %v500_v40  ;;  %v513_v48 = vadd.f32 %v512_v39, %v491_v45 }
 0x638   :  { %v505_v46 = vsel %vm503_vm2, %v504_v43, %v502_v44 }
 0x639   :  { %v514_v49 = vmul.f32 %v703_v21, %v505_v46 }
 0x63b   :  { %v515_v50 = vadd.f32 %v514_v49, %v513_v48 }
 0x63d   :  { %v519_v52 = vmul.f32 %v711_v51, %v515_v50 }
 0x63f   :  { %v523_v53 = vsel %vm522_vm3, %v519_v52, 0.0 }
 0x640   :  { %v525_v54 = vrot.slane %v523_v53, 4 }
 0x642   :  { %v526_v55 = vadd.f32 %v525_v54, %v523_v53 }
 0x644   :  { %v527_v57 = vrot.slane %v526_v55, 2 }
 0x646   :  { %v528_v58 = vadd.f32 %v527_v57, %v526_v55 }
 0x648   :  { %v529_v60 = vrot.slane %v528_v58, 1 }
 0x64a   :  { %v530_v61 = vadd.f32 %v529_v60, %v528_v58 }
 0x64c   :  { %v531_v63 = vadd.f32 %v530_v61, %v1299_v59 }
 0x64e   :  { %v533_v41 = vadd.f32 %v532_v62, %v531_v63 }
 0x650   :  { %v535_v1 = vadd.f32 %v534_v0, %v533_v41 }
 0x652   :  { %537 = vst.msk [vmem:[#allocation12] sm:$0x1] %vm536_vm4, %v535_v1 }
 0x653   :  { %991 = shalt.err (!%p988_p1)
}
 0x654   :  { %s992_s0 = scalar_lea.hbm %s1350_s7, 16 }
 0x655   :  { %p993_p2 = scmp.ne.s32.totalorder %s1350_s7, %s992_s0  ;;  %p996_p3 = scmp.lt.u32.totalorder %s992_s0, %s1350_s7 }
 0x657   :  { %p998_p4 = pnand %p996_p3, %p993_p2 }
 0x659   :  { %1001 = shalt.err (!%p998_p4)
}
 0x65a   :  { %547 = dma.vmem_to_hbm [thread:$0]  %s545_s4, 16, %s1350_s7, [#allocation8]  }
 0x65b   :  { %1024 = dma.done.wait [#allocation8], 16  }
 0x65c   :  { %1025 = vsyncadd [#allocation8], 4294967280 }
 0x65d   :  { %551 = vsyncpa [#allocation7], 1 }
 0x65e   :  { %552 = vsyncpa [#allocation10], 1 }
 0x65f   :  { %553 = vsyncpa [#allocation8], 1 }
 0x660   :  { %554 = vsyncmov [#allocation3] }
 0x663   :  { %s555_s5 = vpop.sfrf %554 }
 0x664   :  { %p648_p5 = scmp.ne.s32.totalorder %s555_s5, 0 }
 0x666   :  { %559 = shalt.err (%p648_p5)  }
 0x667   :  { %561 = vsyncmov [#allocation3 + $0x1] }
 0x66a   :  { %s562_s22 = vpop.sfrf %561 }
 0x66b   :  { %p649_p6 = scmp.ne.s32.totalorder %s562_s22, 0 }
 0x66d   :  { %566 = shalt.err (%p649_p6)  }
 0x66e   :  { %568 = vsyncmov [#allocation3 + $0x2] }
 0x671   :  { %s569_s2 = vpop.sfrf %568 }
 0x672   :  { %p650_p7 = scmp.ne.s32.totalorder %s569_s2, 0 }
 0x674   :  { %573 = shalt.err (%p650_p7)  }
 0x675   :  { %575 = vsyncmov [#allocation3 + $0x3] }
 0x678   :  { %s576_s23 = vpop.sfrf %575 }
 0x679   :  { %p651_p8 = scmp.ne.s32.totalorder %s576_s23, 0 }
 0x67b   :  { %580 = shalt.err (%p651_p8)  }
 0x67c   :  { %582 = vsyncmov [#allocation3 + $0x4] }
 0x67f   :  { %s583_s7 = vpop.sfrf %582 }
 0x680   :  { %p652_p9 = scmp.ne.s32.totalorder %s583_s7, 0 }
 0x682   :  { %587 = shalt.err (%p652_p9)  }
 0x683   :  { %589 = vsyncmov [#allocation3 + $0x5] }
 0x686   :  { %s590_s30 = vpop.sfrf %589 }
 0x687   :  { %p653_p10 = scmp.ne.s32.totalorder %s590_s30, 0 }
 0x689   :  { %594 = shalt.err (%p653_p10)  }
 0x68a   :  { %596 = vsyncmov [#allocation3 + $0x6] }
 0x68d   :  { %s597_s26 = vpop.sfrf %596 }
 0x68e   :  { %p654_p11 = scmp.ne.s32.totalorder %s597_s26, 0 }
 0x690   :  { %601 = shalt.err (%p654_p11)  }
 0x691   :  { %603 = vsyncmov [#allocation3 + $0x7] }
 0x694   :  { %s604_s27 = vpop.sfrf %603 }
 0x695   :  { %p655_p12 = scmp.ne.s32.totalorder %s604_s27, 0 }
 0x697   :  { %608 = shalt.err (%p655_p12)  }

</bundles_post_ra>
